<compile_context>
chip_gen: v6e
topology: v6e:2x2x1
jax: 0.10.0
libtpu: 0.0.40
codegen_flags: <defaults>
</compile_context>

<pallas_src>
import jax
import jax.numpy as jnp
from jax import lax
from jax.experimental import pallas as pl
from jax.experimental.pallas import tpu as pltpu

# Small, deterministic hyperparameters consistent with TextCNN.__init__
VOCAB_SIZE = 50
VOCAB_PAD = 128                          # lane-dense one-hot / table rows
EMBED_DIM = 32
OUTPUT_SIZE = 5
FILTER_NUM = 8
FILTER_SIZES = (3, 4, 5)
BATCH = 2
SEQ_LEN = 8

KMAX = max(FILTER_SIZES)                 # 5
KMIN = min(FILTER_SIZES)                 # 3
TMAX = SEQ_LEN - KMIN + 1                # 6 valid positions for the widest T (k=3)
LPAD = SEQ_LEN + (KMAX - KMIN)           # 10: pad seq so the fused width-5 window fits
FPAD = 128                               # lane-dense channel / logit width
PAD_TOKEN = 1                            # padding_idx=1 -> zero embedding row
NEG = -1e30                              # finite mask sentinel (safer than -inf)
TB_CAP = 256                             # max batch tile; VMEM use stays << 32 MiB


def textcnn_kernel(tok_ref, table_ref, wconv_ref, init_ref, wfc_ref, bfc_ref, out_ref):
    # tok_ref:   (TB, LPAD)         int32  token ids (pad positions hold PAD_TOKEN)
    # table_ref: (VOCAB_PAD, E)     bf16   embedding table (zero rows for pad/unused)
    # wconv_ref: (KMAX, E, FPAD)    bf16   fused conv weights (zero rows for dk >= k)
    # init_ref:  (TMAX, FPAD)       f32    conv bias + additive time-validity mask
    # wfc_ref:   (FPAD, FPAD)       bf16   padded FC weight
    # bfc_ref:   (1, FPAD)          f32    padded FC bias
    # out_ref:   (TB, FPAD)         f32    padded logits
    TB = tok_ref.shape[0]
    tok = tok_ref[...]                                                 # (TB, LPAD) i32

    # In-kernel embedding lookup: exact one-hot selection done as one MXU matmul
    # (gather-free; tokens are the only per-row HBM input).
    vocab_iota = lax.broadcasted_iota(jnp.int32, (TB, LPAD, VOCAB_PAD), 2)
    onehot = (tok[:, :, None] == vocab_iota).astype(jnp.bfloat16)      # (TB, LPAD, V)
    emb = jnp.einsum("blv,ve->ble", onehot, table_ref[...],
                     preferred_element_type=jnp.float32)               # (TB, LPAD, E)
    emb = emb.astype(jnp.bfloat16)

    # Fused multi-width conv: s[b,t,c] = init[t,c] + sum_dk emb[b,t+dk,:] @ W[dk,:,c]
    # (bias and -1e30 validity mask already folded into init host-side).
    # TODO(synk): the dk-shifted value slices are sublane-misaligned; a single K=160
    # unfolded matmul (v6e/v7x) could cut MXU pushes from 5 to 1 at the cost of a
    # lane-axis concat — kept as K=32 accumulation so v5e stays single-pass.
    acc = jnp.einsum("bte,ec->btc", emb[:, 0:TMAX, :], wconv_ref[0],
                     preferred_element_type=jnp.float32)               # (TB, TMAX, FPAD)
    for dk in range(1, KMAX):                                          # unrolled
        acc = acc + jnp.einsum("bte,ec->btc", emb[:, dk:dk + TMAX, :], wconv_ref[dk],
                               preferred_element_type=jnp.float32)
    s = acc + init_ref[...]                                            # broadcast over TB

    # max-over-time then ReLU (== ReLU then max; ReLU monotone). All f32 elementwise.
    pooled = jnp.maximum(jnp.max(s, axis=1), 0.0)                      # (TB, FPAD)

    # TODO(synk): nn.Dropout is stochastic in train mode; identity here (inference).
    out = jnp.dot(pooled.astype(jnp.bfloat16), wfc_ref[...],
                  preferred_element_type=jnp.float32) + bfc_ref[...]   # (TB, FPAD)
    out_ref[...] = out


def _batch_tile(B):
    """Batch tile (multiple of 8, capped) and padded batch size."""
    tb = min(TB_CAP, ((B + 7) // 8) * 8)
    b_pad = ((B + tb - 1) // tb) * tb
    return tb, b_pad


@jax.jit
def textcnn_forward(tokens, kparams):
    B, L = tokens.shape
    tb, b_pad = _batch_tile(B)
    # Pad seq to LPAD and batch to a TB multiple with PAD_TOKEN (zero embedding row),
    # so padded positions/rows contribute zeros and are discarded by the final slice.
    tok_pad = jnp.pad(tokens.astype(jnp.int32),
                      ((0, b_pad - B), (0, LPAD - L)),
                      constant_values=PAD_TOKEN)

    flops = b_pad * (2 * LPAD * VOCAB_PAD * EMBED_DIM          # one-hot embedding matmul
                     + 2 * KMAX * TMAX * EMBED_DIM * FPAD      # fused conv
                     + 2 * FPAD * FPAD)                        # FC
    bytes_accessed = (b_pad * LPAD * 4 + b_pad * FPAD * 4
                      + VOCAB_PAD * EMBED_DIM * 2 + KMAX * EMBED_DIM * FPAD * 2
                      + TMAX * FPAD * 4 + FPAD * FPAD * 2 + FPAD * 4)

    out = pl.pallas_call(
        textcnn_kernel,
        out_shape=jax.ShapeDtypeStruct((b_pad, FPAD), jnp.float32),
        grid=(b_pad // tb,),
        in_specs=[
            pl.BlockSpec((tb, LPAD), lambda i: (i, 0)),                 # per-tile tokens
            pl.BlockSpec((VOCAB_PAD, EMBED_DIM), lambda i: (0, 0)),     # resident table
            pl.BlockSpec((KMAX, EMBED_DIM, FPAD), lambda i: (0, 0, 0)), # resident weights
            pl.BlockSpec((TMAX, FPAD), lambda i: (0, 0)),               # bias+mask init
            pl.BlockSpec((FPAD, FPAD), lambda i: (0, 0)),
            pl.BlockSpec((1, FPAD), lambda i: (0, 0)),
        ],
        out_specs=pl.BlockSpec((tb, FPAD), lambda i: (i, 0)),           # lane-dense store
        compiler_params=pltpu.CompilerParams(
            dimension_semantics=("parallel",),       # shards batch tiles over v7x's 2 TCs
            vmem_limit_bytes=32 * 1024 * 1024,       # ample: ~85 KiB weights + small tiles
        ),
        cost_estimate=pl.CostEstimate(flops=flops, transcendentals=0,
                                      bytes_accessed=bytes_accessed),
    )(tok_pad, kparams["table"], kparams["wconv"], kparams["conv_init"],
      kparams["wfc"], kparams["bfc"])
    return out[:B, :OUTPUT_SIZE]                     # strip batch / lane padding


def init_params(key):
    """PyTorch-layout parameters (conv weight (F, k, E) == Conv2d (F,1,k,E) squeezed)."""
    keys = jax.random.split(key, 9)
    emb = jax.random.normal(keys[0], (VOCAB_SIZE, EMBED_DIM), jnp.float32) * 0.1
    emb = emb.at[PAD_TOKEN].set(0.0)  # padding_idx=1 -> zero row
    params = {"embedding": emb}
    for i, k in enumerate(FILTER_SIZES):
        params[f"w{k}"] = jax.random.normal(
            keys[1 + 2 * i], (FILTER_NUM, k, EMBED_DIM), jnp.float32) * 0.1
        params[f"b{k}"] = jax.random.normal(keys[2 + 2 * i], (FILTER_NUM,), jnp.float32) * 0.1
    params["wfc"] = jax.random.normal(
        keys[7], (OUTPUT_SIZE, FILTER_NUM * len(FILTER_SIZES)), jnp.float32) * 0.1
    params["bfc"] = jax.random.normal(keys[8], (OUTPUT_SIZE,), jnp.float32) * 0.1
    return params


def pack_params(params):
    """Fuse / pad weights into the lane-dense, bf16 form the kernel consumes."""
    table = jnp.pad(params["embedding"], ((0, VOCAB_PAD - VOCAB_SIZE), (0, 0)))
    wcols, bcols = [], []
    for k in FILTER_SIZES:
        w = jnp.transpose(params[f"w{k}"], (1, 2, 0))          # (k, E, F)
        w = jnp.pad(w, ((0, KMAX - k), (0, 0), (0, 0)))        # zero rows for dk >= k
        wcols.append(w)
        bcols.append(params[f"b{k}"])
    wconv = jnp.concatenate(wcols, axis=-1)                    # (KMAX, E, 3F)
    wconv = jnp.pad(wconv, ((0, 0), (0, 0), (0, FPAD - wconv.shape[-1])))
    bconv = jnp.pad(jnp.concatenate(bcols),
                    (0, FPAD - FILTER_NUM * len(FILTER_SIZES)))          # (FPAD,)
    # Host-side additive validity mask (0 for valid window positions, -1e30 for windows
    # of width-k filters that would overlap the zero-pad rows), with the bias folded in.
    t = jnp.arange(TMAX)[:, None]
    c = jnp.arange(FPAD)[None, :]
    limit = jnp.where(c < FILTER_NUM, SEQ_LEN - FILTER_SIZES[0] + 1,
            jnp.where(c < 2 * FILTER_NUM, SEQ_LEN - FILTER_SIZES[1] + 1,
            jnp.where(c < 3 * FILTER_NUM, SEQ_LEN - FILTER_SIZES[2] + 1, TMAX)))
    mask = jnp.where(t < limit, 0.0, NEG)
    conv_init = bconv[None, :] + mask                          # (TMAX, FPAD)
    wfc = params["wfc"].T                                      # (3F, O)
    wfc = jnp.pad(wfc, ((0, FPAD - wfc.shape[0]), (0, FPAD - wfc.shape[1])))
    bfc = jnp.pad(params["bfc"], (0, FPAD - OUTPUT_SIZE)).reshape(1, FPAD)
    return {
        "table": table.astype(jnp.bfloat16),
        "wconv": wconv.astype(jnp.bfloat16),
        "conv_init": conv_init.astype(jnp.float32),
        "wfc": wfc.astype(jnp.bfloat16),
        "bfc": bfc.astype(jnp.float32),
    }


def reference(tokens, params):
    """Pure-JAX f32 reference mirroring the PyTorch forward (dropout = identity)."""
    emb = jnp.take(params["embedding"], tokens, axis=0)        # (B, L, E)
    B, L, _ = emb.shape
    feats = []
    for k in FILTER_SIZES:
        w, b = params[f"w{k}"], params[f"b{k}"]                # (F, k, E), (F,)
        T = L - k + 1
        s = jnp.stack(
            [jnp.einsum("bke,fke->bf", emb[:, t:t + k, :], w) for t in range(T)],
            axis=1) + b                                        # (B, T, F)
        s = jnp.maximum(s, 0.0)
        feats.append(jnp.max(s, axis=1))
    feat = jnp.concatenate(feats, axis=-1)                     # (B, 3F)
    return feat @ params["wfc"].T + params["bfc"]


if __name__ == "__main__":
    key = jax.random.PRNGKey(0)
    pkey, tkey = jax.random.split(key)
    params = init_params(pkey)
    kparams = pack_params(params)
    tokens = jax.random.randint(tkey, (BATCH, SEQ_LEN), 0, VOCAB_SIZE, dtype=jnp.int32)

    out = jax.block_until_ready(textcnn_forward(tokens, kparams))
    ref = reference(tokens, params)

    assert out.shape == (BATCH, OUTPUT_SIZE), out.shape
    # Tolerance accounts for bf16 MXU inputs (f32 accumulation) vs the f32 reference.
    assert jnp.allclose(out, ref, atol=1e-2, rtol=1e-2), (out, ref)
    print("KERNEL_OK")
</pallas_src>

<mosaic_0001>
module attributes {stable_mosaic.version = 11 : i64} {
  func.func @textcnn_kernel(%arg0: i32, %arg1: memref<8x10xi32, #tpu.memory_space<vmem>>, %arg2: memref<128x32xbf16, #tpu.memory_space<vmem>>, %arg3: memref<5x32x128xbf16, #tpu.memory_space<vmem>>, %arg4: memref<6x128xf32, #tpu.memory_space<vmem>>, %arg5: memref<128x128xbf16, #tpu.memory_space<vmem>>, %arg6: memref<1x128xf32, #tpu.memory_space<vmem>>, %arg7: memref<8x128xf32, #tpu.memory_space<vmem>>) attributes {dimension_semantics = [#tpu.dimension_semantics<parallel>], iteration_bounds = array<i64: 1>, scalar_prefetch = 0 : i64, scratch_operands = 0 : i64, tpu.core_type = #tpu.core_type<tc>, window_params = [{transform_indices = @transform_0, window_bounds = array<i64: 8, 10>}, {pipeline_mode = #tpu.pipeline_mode<synchronous>, transform_indices = @transform_1, window_bounds = array<i64: 128, 32>}, {pipeline_mode = #tpu.pipeline_mode<synchronous>, transform_indices = @transform_2, window_bounds = array<i64: 5, 32, 128>}, {pipeline_mode = #tpu.pipeline_mode<synchronous>, transform_indices = @transform_3, window_bounds = array<i64: 6, 128>}, {pipeline_mode = #tpu.pipeline_mode<synchronous>, transform_indices = @transform_4, window_bounds = array<i64: 128, 128>}, {pipeline_mode = #tpu.pipeline_mode<synchronous>, transform_indices = @transform_5, window_bounds = array<i64: 1, 128>}, {transform_indices = @transform_6, window_bounds = array<i64: 8, 128>}]} {
    %c0 = arith.constant 0 : index
    %c0_0 = arith.constant 0 : index
    %0 = vector.load %arg1[%c0, %c0_0] : memref<8x10xi32, #tpu.memory_space<vmem>>, vector<8x10xi32>
    %1 = tpu.iota {dimensions = array<i32: 2>} : vector<8x10x128xi32>
    %2 = vector.shape_cast %0 : vector<8x10xi32> to vector<8x10x1xi32>
    %3 = vector.broadcast %2 : vector<8x10x1xi32> to vector<8x10x128xi32>
    %4 = arith.cmpi eq, %3, %1 : vector<8x10x128xi32>
    %5 = arith.extui %4 : vector<8x10x128xi1> to vector<8x10x128xi32>
    %6 = arith.sitofp %5 : vector<8x10x128xi32> to vector<8x10x128xf32>
    %7 = arith.truncf %6 : vector<8x10x128xf32> to vector<8x10x128xbf16>
    %c0_1 = arith.constant 0 : index
    %c0_2 = arith.constant 0 : index
    %8 = vector.load %arg2[%c0_1, %c0_2] : memref<128x32xbf16, #tpu.memory_space<vmem>>, vector<128x32xbf16>
    "tpu.trace_start"() <{level = 10 : i32, message = "blv,ve->ble"}> : () -> ()
    %cst = arith.constant dense<0.000000e+00> : vector<8x10x32xf32>
    %9 = tpu.matmul %7, %8, %cst {dimension_numbers = #tpu.dot_dimension_numbers<[2], [0], [0, 1], [1], [0, 0, 0, 1, 1, 1], [], []>} : vector<8x10x128xbf16>, vector<128x32xbf16>, vector<8x10x32xf32> -> vector<8x10x32xf32>
    "tpu.trace_stop"() : () -> ()
    %10 = arith.truncf %9 : vector<8x10x32xf32> to vector<8x10x32xbf16>
    %11 = vector.extract_strided_slice %10 {offsets = [0, 0, 0], sizes = [8, 6, 32], strides = [1, 1, 1]} : vector<8x10x32xbf16> to vector<8x6x32xbf16>
    %c0_3 = arith.constant 0 : index
    %c0_4 = arith.constant 0 : index
    %c0_5 = arith.constant 0 : index
    %12 = vector.load %arg3[%c0_3, %c0_4, %c0_5] : memref<5x32x128xbf16, #tpu.memory_space<vmem>>, vector<1x32x128xbf16>
    %13 = vector.shape_cast %12 : vector<1x32x128xbf16> to vector<32x128xbf16>
    "tpu.trace_start"() <{level = 10 : i32, message = "bte,ec->btc"}> : () -> ()
    %cst_6 = arith.constant dense<0.000000e+00> : vector<8x6x128xf32>
    %14 = tpu.matmul %11, %13, %cst_6 {dimension_numbers = #tpu.dot_dimension_numbers<[2], [0], [0, 1], [1], [0, 0, 0, 1, 1, 1], [], []>} : vector<8x6x32xbf16>, vector<32x128xbf16>, vector<8x6x128xf32> -> vector<8x6x128xf32>
    "tpu.trace_stop"() : () -> ()
    %15 = vector.extract_strided_slice %10 {offsets = [0, 1, 0], sizes = [8, 6, 32], strides = [1, 1, 1]} : vector<8x10x32xbf16> to vector<8x6x32xbf16>
    %c1 = arith.constant 1 : index
    %c0_7 = arith.constant 0 : index
    %c0_8 = arith.constant 0 : index
    %16 = vector.load %arg3[%c1, %c0_7, %c0_8] : memref<5x32x128xbf16, #tpu.memory_space<vmem>>, vector<1x32x128xbf16>
    %17 = vector.shape_cast %16 : vector<1x32x128xbf16> to vector<32x128xbf16>
    "tpu.trace_start"() <{level = 10 : i32, message = "bte,ec->btc"}> : () -> ()
    %cst_9 = arith.constant dense<0.000000e+00> : vector<8x6x128xf32>
    %18 = tpu.matmul %15, %17, %cst_9 {dimension_numbers = #tpu.dot_dimension_numbers<[2], [0], [0, 1], [1], [0, 0, 0, 1, 1, 1], [], []>} : vector<8x6x32xbf16>, vector<32x128xbf16>, vector<8x6x128xf32> -> vector<8x6x128xf32>
    "tpu.trace_stop"() : () -> ()
    %19 = arith.addf %14, %18 : vector<8x6x128xf32>
    %20 = vector.extract_strided_slice %10 {offsets = [0, 2, 0], sizes = [8, 6, 32], strides = [1, 1, 1]} : vector<8x10x32xbf16> to vector<8x6x32xbf16>
    %c2 = arith.constant 2 : index
    %c0_10 = arith.constant 0 : index
    %c0_11 = arith.constant 0 : index
    %21 = vector.load %arg3[%c2, %c0_10, %c0_11] : memref<5x32x128xbf16, #tpu.memory_space<vmem>>, vector<1x32x128xbf16>
    %22 = vector.shape_cast %21 : vector<1x32x128xbf16> to vector<32x128xbf16>
    "tpu.trace_start"() <{level = 10 : i32, message = "bte,ec->btc"}> : () -> ()
    %cst_12 = arith.constant dense<0.000000e+00> : vector<8x6x128xf32>
    %23 = tpu.matmul %20, %22, %cst_12 {dimension_numbers = #tpu.dot_dimension_numbers<[2], [0], [0, 1], [1], [0, 0, 0, 1, 1, 1], [], []>} : vector<8x6x32xbf16>, vector<32x128xbf16>, vector<8x6x128xf32> -> vector<8x6x128xf32>
    "tpu.trace_stop"() : () -> ()
    %24 = arith.addf %19, %23 : vector<8x6x128xf32>
    %25 = vector.extract_strided_slice %10 {offsets = [0, 3, 0], sizes = [8, 6, 32], strides = [1, 1, 1]} : vector<8x10x32xbf16> to vector<8x6x32xbf16>
    %c3 = arith.constant 3 : index
    %c0_13 = arith.constant 0 : index
    %c0_14 = arith.constant 0 : index
    %26 = vector.load %arg3[%c3, %c0_13, %c0_14] : memref<5x32x128xbf16, #tpu.memory_space<vmem>>, vector<1x32x128xbf16>
    %27 = vector.shape_cast %26 : vector<1x32x128xbf16> to vector<32x128xbf16>
    "tpu.trace_start"() <{level = 10 : i32, message = "bte,ec->btc"}> : () -> ()
    %cst_15 = arith.constant dense<0.000000e+00> : vector<8x6x128xf32>
    %28 = tpu.matmul %25, %27, %cst_15 {dimension_numbers = #tpu.dot_dimension_numbers<[2], [0], [0, 1], [1], [0, 0, 0, 1, 1, 1], [], []>} : vector<8x6x32xbf16>, vector<32x128xbf16>, vector<8x6x128xf32> -> vector<8x6x128xf32>
    "tpu.trace_stop"() : () -> ()
    %29 = arith.addf %24, %28 : vector<8x6x128xf32>
    %30 = vector.extract_strided_slice %10 {offsets = [0, 4, 0], sizes = [8, 6, 32], strides = [1, 1, 1]} : vector<8x10x32xbf16> to vector<8x6x32xbf16>
    %c4 = arith.constant 4 : index
    %c0_16 = arith.constant 0 : index
    %c0_17 = arith.constant 0 : index
    %31 = vector.load %arg3[%c4, %c0_16, %c0_17] : memref<5x32x128xbf16, #tpu.memory_space<vmem>>, vector<1x32x128xbf16>
    %32 = vector.shape_cast %31 : vector<1x32x128xbf16> to vector<32x128xbf16>
    "tpu.trace_start"() <{level = 10 : i32, message = "bte,ec->btc"}> : () -> ()
    %cst_18 = arith.constant dense<0.000000e+00> : vector<8x6x128xf32>
    %33 = tpu.matmul %30, %32, %cst_18 {dimension_numbers = #tpu.dot_dimension_numbers<[2], [0], [0, 1], [1], [0, 0, 0, 1, 1, 1], [], []>} : vector<8x6x32xbf16>, vector<32x128xbf16>, vector<8x6x128xf32> -> vector<8x6x128xf32>
    "tpu.trace_stop"() : () -> ()
    %34 = arith.addf %29, %33 : vector<8x6x128xf32>
    %c0_19 = arith.constant 0 : index
    %c0_20 = arith.constant 0 : index
    %35 = vector.load %arg4[%c0_19, %c0_20] : memref<6x128xf32, #tpu.memory_space<vmem>>, vector<6x128xf32>
    %36 = vector.shape_cast %35 : vector<6x128xf32> to vector<1x6x128xf32>
    %37 = vector.broadcast %36 : vector<1x6x128xf32> to vector<8x6x128xf32>
    %38 = arith.addf %34, %37 : vector<8x6x128xf32>
    %cst_21 = arith.constant dense<0xFF800000> : vector<8x128xf32>
    %39 = vector.multi_reduction <maximumf>, %38, %cst_21 [1] : vector<8x6x128xf32> to vector<8x128xf32>
    %cst_22 = arith.constant 0.000000e+00 : f32
    %40 = vector.broadcast %cst_22 : f32 to vector<8x128xf32>
    %41 = arith.maximumf %39, %40 : vector<8x128xf32>
    %42 = arith.truncf %41 : vector<8x128xf32> to vector<8x128xbf16>
    %c0_23 = arith.constant 0 : index
    %c0_24 = arith.constant 0 : index
    %43 = vector.load %arg5[%c0_23, %c0_24] : memref<128x128xbf16, #tpu.memory_space<vmem>>, vector<128x128xbf16>
    %cst_25 = arith.constant dense<0.000000e+00> : vector<8x128xf32>
    %44 = tpu.matmul %42, %43, %cst_25 {dimension_numbers = #tpu.dot_dimension_numbers<[1], [0], [0], [1], [0, 0, 1, 1], [], []>} : vector<8x128xbf16>, vector<128x128xbf16>, vector<8x128xf32> -> vector<8x128xf32>
    %c0_26 = arith.constant 0 : index
    %c0_27 = arith.constant 0 : index
    %45 = vector.load %arg6[%c0_26, %c0_27] : memref<1x128xf32, #tpu.memory_space<vmem>>, vector<1x128xf32>
    %46 = vector.broadcast %45 : vector<1x128xf32> to vector<8x128xf32>
    %47 = arith.addf %44, %46 : vector<8x128xf32>
    %c0_28 = arith.constant 0 : index
    %c0_29 = arith.constant 0 : index
    %48 = vector.load %arg7[%c0_28, %c0_29] : memref<8x128xf32, #tpu.memory_space<vmem>>, vector<8x128xf32>
    tpu.vector_store %arg7[%c0_28, %c0_29], %47 {strides = array<i32>} : memref<8x128xf32, #tpu.memory_space<vmem>>, vector<8x128xf32>,
    return
  }
  func.func @transform_0(%arg0: i32) -> (i32, i32) {
    %c0_i32 = arith.constant 0 : i32
    %c0_i32_0 = arith.constant 0 : i32
    return %arg0, %c0_i32 : i32, i32
  }
  func.func @transform_1(%arg0: i32) -> (i32, i32) {
    %c0_i32 = arith.constant 0 : i32
    %c0_i32_0 = arith.constant 0 : i32
    %c0_i32_1 = arith.constant 0 : i32
    return %c0_i32, %c0_i32_0 : i32, i32
  }
  func.func @transform_2(%arg0: i32) -> (i32, i32, i32) {
    %c0_i32 = arith.constant 0 : i32
    %c0_i32_0 = arith.constant 0 : i32
    %c0_i32_1 = arith.constant 0 : i32
    %c0_i32_2 = arith.constant 0 : i32
    return %c0_i32, %c0_i32_0, %c0_i32_1 : i32, i32, i32
  }
  func.func @transform_3(%arg0: i32) -> (i32, i32) {
    %c0_i32 = arith.constant 0 : i32
    %c0_i32_0 = arith.constant 0 : i32
    %c0_i32_1 = arith.constant 0 : i32
    return %c0_i32, %c0_i32_0 : i32, i32
  }
  func.func @transform_4(%arg0: i32) -> (i32, i32) {
    %c0_i32 = arith.constant 0 : i32
    %c0_i32_0 = arith.constant 0 : i32
    %c0_i32_1 = arith.constant 0 : i32
    return %c0_i32, %c0_i32_0 : i32, i32
  }
  func.func @transform_5(%arg0: i32) -> (i32, i32) {
    %c0_i32 = arith.constant 0 : i32
    %c0_i32_0 = arith.constant 0 : i32
    %c0_i32_1 = arith.constant 0 : i32
    return %c0_i32, %c0_i32_0 : i32, i32
  }
  func.func @transform_6(%arg0: i32) -> (i32, i32) {
    %c0_i32 = arith.constant 0 : i32
    %c0_i32_0 = arith.constant 0 : i32
    return %arg0, %c0_i32 : i32, i32
  }
}

</mosaic_0001>

<bundles_post_ra>
// kernel: textcnn_forward.1
= control target key start
LH: loop header
LB: loop body
LE: loop exit
PB: predicated region body
PF: predicated region fallthrough
CT: control target
= control target key end

     0   :  { %11 = vsyncpa [#allocation3], 0  ;;  %s4437_s21 = smov [#allocation2]   ;;  %s5649_s0 = inlined_call_operand.vmem [shape: s32[8,10], index: 0, kind: input, shape index: {}]   ;;  %s5650_s1 = inlined_call_operand.vmem [shape: bf16[128,32], index: 1, kind: input, shape index: {}]   ;;  %s5651_s2 = inlined_call_operand.vmem [shape: bf16[5,32,128], index: 2, kind: input, shape index: {}]   ;;  %s5652_s3 = inlined_call_operand.vmem [shape: f32[6,128], index: 3, kind: input, shape index: {}]   ;;  %s5653_s4 = inlined_call_operand.hbm [shape: bf16[128,128], index: 4, kind: input, shape index: {}]   ;;  %s5654_s5 = inlined_call_operand.vmem [shape: f32[1,128], index: 5, kind: input, shape index: {}]   ;;  %s5655_s6 = inlined_call_operand.vmem [shape: f32[8,128], index: 6, kind: output, shape index: {}]  }
   0x1   :  { %s25_s22 = sshll.u32 %s4437_s21, 4  ;;  %s26_s22 = int_to_ptr.vmem [resolvable:$true] %s25_s22 }
   0x2   :  { %s4423_s23 = scalar_lea.vmem %s26_s22, 1024  ;;  %p4428_p1 = scmp.lt.s32.totalorder %s26_s22, %s26_s22 }
   0x3   :  { %p4424_p0 = scmp.ne.s32.totalorder %s26_s22, %s4423_s23  ;;  %p4429_p2 = scmp.lt.s32.totalorder %s4423_s23, %s4423_s23 }
   0x5   :  { %p4430_p3 = por %p4429_p2, %p4428_p1 }
   0x7   :  { %p4431_p4 = pnand %p4430_p3, %p4424_p0 }
   0x9   :  { %4434 = shalt.err (!%p4431_p4)
}
   0xa   :  { %s4438_s24 = smov 64   ;;  %s4439_s25 = smov 4  }
   0xb   :  { %31 = dma.hbm_to_vmem [thread:$0]  %s5653_s4, 1024, %s26_s22, [#allocation3], %s4438_s24, %s4438_s24, %s4439_s25  }
   0xc   :  { %4435 = dma.done.wait [#allocation3], 1024  }
   0xd   :  { %4436 = vsyncadd [#allocation3], 4294966272  ;;  %v39_v0 = vlaneseq  ;;  %v5656_v2 = vmov 0.0   ;;  %v38_v5 = vld [vmem:[%s5649_s0] sm:$0xff]  ;;  %v4388_v8 = vld [vmem:[%s5650_s1 + $0x38] sm:$0xff]   ;;  %vm4441_vm0 = vmmov 0  }
   0xe   :  { %4245 = vmatprep.subr.bf16.mxu0 %v5656_v2  ;;  %4281 = vmatprep.subr.bf16.mxu1 %v5656_v2  ;;  %v4389_v10 = vld [vmem:[%s5650_s1 + $0x30] sm:$0xff]   ;;  %v4390_v15 = vld [vmem:[%s5650_s1 + $0x28] sm:$0xff]   ;;  %v4391_v18 = vld [vmem:[%s5650_s1 + $0x20] sm:$0xff]   ;;  %v4442_v28 = vmov 1966171168  }
   0xf   :  { %v4483_v1 = vshrl.u32 %v39_v0, 7  ;;  %4246 = vmatpush3.bf16.msra.mxu0 %v4388_v8  ;;  %v4392_v20 = vld [vmem:[%s5650_s1 + $0x18] sm:$0xff]   ;;  %4261 = vmatprep.mubr.msk.bf16.mxu0 %vm4441_vm0, %v5656_v2  ;;  %v4393_v21 = vld [vmem:[%s5650_s1 + $0x10] sm:$0xff]   ;;  %v4394_v25 = vld [vmem:[%s5650_s1 + $0x8] sm:$0xff]   ;;  %v211_v29 = vunpack.c.l.s4 %v4442_v28  ;;  %v4535_v30 = vand.u32 127, %v39_v0 }
  0x10   :  { %4247 = vmatprep.subr.bf16.mxu0 %v5656_v2  ;;  %4285 = vmatprep.mubr.msk.bf16.mxu1 %vm4441_vm0, %v5656_v2  ;;  %v4395_v27 = vld [vmem:[%s5650_s1] sm:$0xff]  }
  0x11   :  { %v54_v3 = vsub.s32 1, %v4483_v1  ;;  %v43_v4 = vsub.s32 0, %v4483_v1  ;;  %v65_v9 = vsub.s32 2, %v4483_v1  ;;  %v76_v11 = vsub.s32 3, %v4483_v1 }
  0x12   :  { %v87_v12 = vsub.s32 4, %v4483_v1  ;;  %v98_v14 = vsub.s32 5, %v4483_v1  ;;  %v109_v17 = vsub.s32 6, %v4483_v1  ;;  %v120_v24 = vsub.s32 7, %v4483_v1 }
  0x13   :  { %v55_v6 = vrot.slane %v38_v5, %v54_v3  ;;  %v44_v7 = vrot.slane %v38_v5, %v43_v4  ;;  %v66_v13 = vrot.slane %v38_v5, %v65_v9  ;;  %4248 = vmatpush3.bf16.msra.mxu0 %v4389_v10  ;;  %v77_v16 = vrot.slane %v38_v5, %v76_v11 }
  0x14   :  { %4249 = vmatprep.subr.bf16.mxu0 %v5656_v2  ;;  %v88_v19 = vrot.slane %v38_v5, %v87_v12  ;;  %v99_v22 = vrot.slane %v38_v5, %v98_v14  ;;  %v110_v23 = vrot.slane %v38_v5, %v109_v17  ;;  %v121_v26 = vrot.slane %v38_v5, %v120_v24 }
  0x15   :  { %57 = vbcast.lane.b32.xlu1 %v55_v6, 256  ;;  %46 = vbcast.lane.b32.xlu0 %v44_v7, 256  ;;  %v212_v33 = vunpack.c.0.s8 %v211_v29 }
  0x17   :  { %4250 = vmatpush3.bf16.msra.mxu0 %v4390_v15  ;;  %v4540_v36 = vsub.s32 %v212_v33, %v4483_v1 }
  0x18   :  { %4251 = vmatprep.subr.bf16.mxu0 %v5656_v2 }
  0x19   :  { %61 = vbcast.lane.b32.xlu1 %v55_v6, 264  ;;  %50 = vbcast.lane.b32.xlu0 %v44_v7, 264 }
  0x1b   :  { %4252 = vmatpush3.bf16.msra.mxu0 %v4391_v18 }
  0x1c   :  { %4253 = vmatprep.subr.bf16.mxu0 %v5656_v2 }
  0x1d   :  { %72 = vbcast.lane.b32.xlu1 %v66_v13, 264  ;;  %68 = vbcast.lane.b32.xlu0 %v66_v13, 256 }
  0x1f   :  { %4254 = vmatpush3.bf16.msra.mxu0 %v4392_v20 }
  0x20   :  { %4255 = vmatprep.subr.bf16.mxu0 %v5656_v2 }
  0x21   :  { %83 = vbcast.lane.b32.xlu1 %v77_v16, 264  ;;  %79 = vbcast.lane.b32.xlu0 %v77_v16, 256 }
  0x23   :  { %4256 = vmatpush3.bf16.msra.mxu0 %v4393_v21 }
  0x24   :  { %4257 = vmatprep.subr.bf16.mxu0 %v5656_v2 }
  0x25   :  { %94 = vbcast.lane.b32.xlu1 %v88_v19, 264  ;;  %90 = vbcast.lane.b32.xlu0 %v88_v19, 256 }
  0x27   :  { %4258 = vmatpush3.bf16.msra.mxu0 %v4394_v25 }
  0x28   :  { %4259 = vmatprep.subr.bf16.mxu0 %v5656_v2 }
  0x29   :  { %105 = vbcast.lane.b32.xlu1 %v99_v22, 264  ;;  %101 = vbcast.lane.b32.xlu0 %v99_v22, 256 }
  0x2b   :  { %4260 = vmatpush3.bf16.msra.mxu0 %v4395_v27 }
  0x2c   :  { %4329 = vmatprep.subr.bf16.mxu0 %v5656_v2 }
  0x2d   :  { %116 = vbcast.lane.b32.xlu1 %v110_v23, 264  ;;  %112 = vbcast.lane.b32.xlu0 %v110_v23, 256 }
  0x31   :  { %127 = vbcast.lane.b32.xlu1 %v121_v26, 264  ;;  %123 = vbcast.lane.b32.xlu0 %v121_v26, 256 }
  0x87   :  { %v58_v31 = vpop.permute.xlu1 %57  ;;  %v47_v32 = vpop.permute.xlu0 %46 }
  0x88   :  { %vm131_vm1 = vcmp.eq.s32.totalorder %v58_v31, %v4535_v30  ;;  %vm129_vm2 = vcmp.eq.s32.totalorder %v47_v32, %v4535_v30 }
  0x89   :  { %v4066_v37 = vsel %vm131_vm1, 1.0, %v5656_v2  ;;  %v4064_v38 = vsel %vm129_vm2, 1.0, %v5656_v2  ;;  %vm1497_vm2 = vsmask.f32 256 }
  0x8b   :  { %v62_v34 = vpop.permute.xlu1 %61  ;;  %v51_v35 = vpop.permute.xlu0 %50 }
  0x8c   :  { %vm132_vm3 = vcmp.eq.s32.totalorder %v62_v34, %v4535_v30  ;;  %vm130_vm4 = vcmp.eq.s32.totalorder %v51_v35, %v4535_v30 }
  0x8d   :  { %v4067_v39 = vsel %vm132_vm3, 1.0, %v5656_v2  ;;  %v4065_v40 = vsel %vm130_vm4, 1.0, %v5656_v2  ;;  %vm1498_vm3 = vsmask.f32 1284 }
  0x8e   :  { %v178_v41 = vpack.c.bf16 %v4067_v39, %v4066_v37  ;;  %v177_v42 = vpack.c.bf16 %v4065_v40, %v4064_v38  ;;  %v4080_v43 = vpack.c.bf16 %v4065_v40, %v4065_v40  ;;  %v4081_v46 = vpack.c.bf16 %v4067_v39, %v4067_v39  ;;  %vm1499_vm4 = vmor %vm1497_vm2, %vm1498_vm3 }
  0x8f   :  { %v73_v44 = vpop.permute.xlu1 %72  ;;  %v69_v45 = vpop.permute.xlu0 %68  ;;  %vm1871_vm2 = vcmask 261120   ;;  %vm3954_vm3 = vcmask 1041409  }
  0x90   :  { %v255_v47 = vrot.slane %v178_v41, %v4540_v36  ;;  %v216_v48 = vrot.slane %v177_v42, %v4540_v36  ;;  %vm134_vm5 = vcmp.eq.s32.totalorder %v73_v44, %v4535_v30  ;;  %vm133_vm6 = vcmp.eq.s32.totalorder %v69_v45, %v4535_v30 }
  0x91   :  { %v223_v50 = vrot.slane %v4080_v43, %v4540_v36  ;;  %v4069_v53 = vsel %vm134_vm5, 1.0, %v5656_v2  ;;  %v4068_v54 = vsel %vm133_vm6, 1.0, %v5656_v2  ;;  %v262_v57 = vrot.slane %v4081_v46, %v4540_v36 }
  0x92   :  { %v263_v49 = vcombine.high %v255_v47, %v255_v47  ;;  %v224_v51 = vcombine.high %v216_v48, %v216_v48  ;;  %v270_v52 = vrot.slane %v255_v47, %v4540_v36  ;;  %v4082_v60 = vpack.c.bf16 %v4069_v53, %v4069_v53 }
  0x93   :  { %v84_v55 = vpop.permute.xlu1 %83  ;;  %v80_v56 = vpop.permute.xlu0 %79  ;;  %v179_v61 = vpack.c.bf16 %v4069_v53, %v4068_v54  ;;  %v231_v62 = vrot.slane %v216_v48, %v4540_v36  ;;  %v238_v63 = vrot.slane %v223_v50, %v4540_v36  ;;  %v277_v11 = vrot.slane %v262_v57, %v4540_v36 }
  0x94   :  { %v284_v58 = vrot.slane %v263_v49, %v4540_v36  ;;  %v245_v59 = vrot.slane %v224_v51, %v4540_v36  ;;  %vm136_vm7 = vcmp.eq.s32.totalorder %v84_v55, %v4535_v30  ;;  %vm135_vm8 = vcmp.eq.s32.totalorder %v80_v56, %v4535_v30 }
  0x95   :  { %v285_v0 = vcombine.high %v270_v52, %v270_v52  ;;  %v294_v3 = vrot.slane %v179_v61, %v4540_v36  ;;  %v4071_v4 = vsel %vm136_vm7, 1.0, %v5656_v2  ;;  %v4070_v5 = vsel %vm135_vm8, 1.0, %v5656_v2 }
  0x96   :  { %v286_v8 = vcombine.high %v284_v58, %v284_v58  ;;  %v4083_v9 = vpack.c.bf16 %v4071_v4, %v4071_v4  ;;  %v180_v10 = vpack.c.bf16 %v4071_v4, %v4070_v5  ;;  %v521_v12 = vcombine.low %v231_v62, %v245_v59 }
  0x97   :  { %v95_v6 = vpop.permute.xlu1 %94  ;;  %v91_v7 = vpop.permute.xlu0 %90  ;;  %v301_v13 = vrot.slane %v4082_v60, %v4540_v36  ;;  %v4088_v14 = vcombine.high %v231_v62, %v245_v59  ;;  %v302_v15 = vcombine.high %v294_v3, %v294_v3  ;;  %v524_v21 = vcombine.low %v284_v58, %v285_v0 }
  0x98   :  { %vm138_vm9 = vcmp.eq.s32.totalorder %v95_v6, %v4535_v30  ;;  %vm137_vm10 = vcmp.eq.s32.totalorder %v91_v7, %v4535_v30  ;;  %v333_v17 = vrot.slane %v180_v10, %v4540_v36  ;;  %v4573_v22 = vcombine.low %v286_v8, %v277_v11 }
  0x99   :  { %v4073_v16 = vsel %vm138_vm9, 1.0, %v5656_v2  ;;  %v4072_v18 = vsel %vm137_vm10, 1.0, %v5656_v2  ;;  %v523_v23 = vcombine.low %v238_v63, %v270_v52  ;;  %v4576_v24 = vrot.slane %v4083_v9, %v4540_v36 }
  0x9a   :  { %v316_v25 = vrot.slane %v301_v13, %v4540_v36  ;;  %v4084_v26 = vpack.c.bf16 %v4073_v16, %v4073_v16  ;;  %v181_v27 = vpack.c.bf16 %v4073_v16, %v4072_v18  ;;  %v309_v28 = vrot.slane %v294_v3, %v4540_v36 }
  0x9b   :  { %v106_v19 = vpop.permute.xlu1 %105  ;;  %v102_v20 = vpop.permute.xlu0 %101  ;;  %v323_v29 = vrot.slane %v302_v15, %v4540_v36  ;;  %v531_v31 = vrot.slane %v521_v12, %v4540_v36  ;;  %v538_v32 = vrot.slane %v4088_v14, %v4540_v36  ;;  %v341_v33 = vcombine.high %v333_v17, %v333_v17 }
  0x9c   :  { %vm140_vm11 = vcmp.eq.s32.totalorder %v106_v19, %v4535_v30  ;;  %v372_v34 = vrot.slane %v181_v27, %v4540_v36  ;;  %vm139_vm12 = vcmp.eq.s32.totalorder %v102_v20, %v4535_v30  ;;  %v355_v39 = vrot.slane %v4576_v24, %v4540_v36 }
  0x9d   :  { %v4075_v35 = vsel %vm140_vm11, 1.0, %v5656_v2  ;;  %v348_v40 = vrot.slane %v333_v17, %v4540_v36  ;;  %v4074_v42 = vsel %vm139_vm12, 1.0, %v5656_v2  ;;  %v4592_v43 = vrot.slane %v4084_v26, %v4540_v36 }
  0x9e   :  { %v4085_v41 = vpack.c.bf16 %v4075_v35, %v4075_v35  ;;  %v380_v44 = vcombine.high %v372_v34, %v372_v34  ;;  %v182_v45 = vpack.c.bf16 %v4075_v35, %v4074_v42  ;;  %v545_v47 = vrot.slane %v523_v23, %v4540_v36 }
  0x9f   :  { %v117_v37 = vpop.permute.xlu1 %116  ;;  %v113_v38 = vpop.permute.xlu0 %112  ;;  %v552_v48 = vrot.slane %v524_v21, %v4540_v36  ;;  %v362_v49 = vrot.slane %v341_v33, %v4540_v36  ;;  %v363_v50 = vcombine.high %v348_v40, %v348_v40  ;;  %v553_v55 = vcombine.low %v531_v31, %v538_v32 }
  0xa0   :  { %vm142_vm13 = vcmp.eq.s32.totalorder %v117_v37, %v4535_v30  ;;  %vm141_vm14 = vcmp.eq.s32.totalorder %v113_v38, %v4535_v30  ;;  %v411_v51 = vrot.slane %v182_v45, %v4540_v36  ;;  %v4605_v53 = vrot.slane %v4085_v41, %v4540_v36 }
  0xa1   :  { %v4596_v46 = vsel %vm142_vm13, 1.0, %v5656_v2  ;;  %v4076_v52 = vsel %vm141_vm14, 1.0, %v5656_v2  ;;  %v554_v56 = vcombine.low %v545_v47, %v552_v48  ;;  %v571_v58 = vcombine.low %v309_v28, %v323_v29 }
  0xa2   :  { %v183_v54 = vpack.c.bf16 %v4596_v46, %v4076_v52  ;;  %v4089_v59 = vcombine.high %v309_v28, %v323_v29  ;;  %v387_v60 = vrot.slane %v372_v34, %v4540_v36  ;;  %v401_v61 = vrot.slane %v380_v44, %v4540_v36 }
  0xa3   :  { %v128_v57 = vpop.permute.xlu1 %127  ;;  %v419_v62 = vcombine.high %v411_v51, %v411_v51  ;;  %v561_v0 = vrot.slane %v553_v55, %v4540_v36  ;;  %v568_v3 = vrot.slane %v554_v56, %v4540_v36  ;;  %v124_v4 = vpop.permute.xlu0 %123  ;;  %v364_v5 = vcombine.high %v362_v49, %v362_v49 }
  0xa4   :  { %v450_v63 = vrot.slane %v183_v54, %v4540_v36  ;;  %v573_v6 = vcombine.low %v316_v25, %v348_v40  ;;  %v619_v7 = vcombine.low %v362_v49, %v363_v50  ;;  %vm144_vm15 = vcmp.eq.s32.totalorder %v128_v57, %v4535_v30 }
  0xa5   :  { %v433_v8 = vrot.slane %v4605_v53, %v4540_v36  ;;  %v426_v9 = vrot.slane %v411_v51, %v4540_v36  ;;  %v4086_v10 = vpack.c.bf16 %v4596_v46, %v4596_v46  ;;  %v569_v11 = vcombine.low %v561_v0, %v568_v3 }
  0xa6   :  { %v621_v12 = vcombine.low %v387_v60, %v401_v61  ;;  %v458_v13 = vcombine.high %v450_v63, %v450_v63  ;;  %v4079_v14 = vsel %vm144_vm15, 1.0, %v5656_v2  ;;  %vm143_vm1 = vcmp.eq.s32.totalorder %v124_v4, %v4535_v30 }
  0xa7   :  { %v4090_v15 = vcombine.high %v387_v60, %v401_v61  ;;  %v440_v16 = vrot.slane %v419_v62, %v4540_v36  ;;  %4262 = vmatmul.mubr.bf16.vlgmr.msra.gmra.mxu0 %v569_v11  ;;  %v4078_v17 = vsel %vm143_vm1, 1.0, %v5656_v2  ;;  %v580_v18 = vrot.slane %v4573_v22, %v4540_v36 }
  0xa8   :  { %v184_v19 = vpack.c.bf16 %v4079_v14, %v4078_v17  ;;  %4265 = vmatprep.mubr.msk.bf16.mxu0 %vm4441_vm0, %v5656_v2  ;;  %v587_v20 = vrot.slane %v571_v58, %v4540_v36  ;;  %v594_v21 = vrot.slane %v4089_v59, %v4540_v36  ;;  %v601_v23 = vrot.slane %v573_v6, %v4540_v36 }
  0xa9   :  { %v441_v30 = vcombine.high %v426_v9, %v426_v9  ;;  %v465_v24 = vrot.slane %v450_v63, %v4540_v36  ;;  %v4087_v25 = vpack.c.bf16 %v4079_v14, %v4079_v14  ;;  %v620_v26 = vcombine.low %v364_v5, %v355_v39 }
  0xaa   :  { %v479_v27 = vrot.slane %v458_v13, %v4540_v36  ;;  %v489_v28 = vrot.slane %v184_v19, %v4540_v36  ;;  %v602_v22 = vcombine.low %v580_v18, %v587_v20  ;;  %v603_v29 = vcombine.low %v594_v21, %v601_v23  ;;  %v4396_v19 = vld [vmem:[%s5651_s2 + $0x18] sm:$0xff]   ;;  %v4398_v21 = vld [vmem:[%s5651_s2 + $0x10] sm:$0xff]  }
  0xab   :  { %v442_v31 = vcombine.high %v440_v16, %v440_v16  ;;  %v629_v32 = vrot.slane %v619_v7, %v4540_v36  ;;  %v643_v33 = vrot.slane %v621_v12, %v4540_v36  ;;  %v650_v34 = vrot.slane %v4090_v15, %v4540_v36  ;;  %4282 = vmatpush3.bf16.msra.mxu1 %v4396_v19  ;;  %v4397_v20 = vld [vmem:[%s5651_s2 + $0x38] sm:$0xff]   ;;  %v4399_v23 = vld [vmem:[%s5651_s2 + $0x30] sm:$0xff]  }
  0xac   :  { %v497_v35 = vcombine.high %v489_v28, %v489_v28  ;;  %v610_v37 = vrot.slane %v602_v22, %v4540_v36  ;;  %v617_v38 = vrot.slane %v603_v29, %v4540_v36  ;;  %v636_v39 = vrot.slane %v620_v26, %v4540_v36  ;;  %4283 = vmatprep.subr.bf16.mxu1 %v5656_v2 }
  0xad   :  { %v394_v40 = vrot.slane %v4592_v43, %v4540_v36  ;;  %v496_v41 = vrot.slane %v4087_v25, %v4540_v36  ;;  %v671_v42 = vcombine.low %v465_v24, %v479_v27  ;;  %v652_v46 = vcombine.low %v643_v33, %v650_v34  ;;  %4330 = vmatpush3.bf16.msra.mxu0 %v4397_v20 }
  0xae   :  { %v518_v44 = vrot.slane %v497_v35, %v4540_v36  ;;  %v618_v45 = vcombine.low %v610_v37, %v617_v38  ;;  %v457_v47 = vrot.slane %v4086_v10, %v4540_v36  ;;  %v669_v48 = vcombine.low %v440_v16, %v441_v30  ;;  %4331 = vmatprep.subr.bf16.mxu0 %v5656_v2 }
  0xaf   :  { %v504_v49 = vrot.slane %v489_v28, %v4540_v36  ;;  %v651_v50 = vcombine.low %v629_v32, %v636_v39  ;;  %v670_v51 = vcombine.low %v442_v31, %v433_v8  ;;  %v668_v52 = vcombine.low %v394_v40, %v426_v9  ;;  %4284 = vmatpush3.bf16.msra.mxu1 %v4398_v21 }
  0xb0   :  { %4266 = vmatmul.mubr.bf16.gmra.mxu0 %v618_v45  ;;  %v511_v53 = vrot.slane %v496_v41, %v4540_v36  ;;  %v520_v54 = vcombine.high %v518_v44, %v518_v44  ;;  %v666_v55 = vrot.slane %v652_v46, %v4540_v36  ;;  %v699_v56 = vrot.slane %v671_v42, %v4540_v36 }
  0xb1   :  { %4269 = vmatprep.mubr.msk.bf16.mxu0 %vm4441_vm0, %v5656_v2  ;;  %v519_v43 = vcombine.high %v504_v49, %v504_v49  ;;  %v472_v57 = vrot.slane %v457_v47, %v4540_v36  ;;  %v659_v58 = vrot.slane %v651_v50, %v4540_v36  ;;  %v685_v59 = vrot.slane %v669_v48, %v4540_v36 }
  0xb2   :  { %v692_v60 = vrot.slane %v670_v51, %v4540_v36  ;;  %v678_v61 = vrot.slane %v668_v52, %v4540_v36  ;;  %v720_v3 = vcombine.low %v520_v54, %v511_v53  ;;  %v4091_v4 = vcombine.high %v465_v24, %v479_v27  ;;  %4297 = vmatprep.subr.bf16.mxu1 %v5656_v2 }
  0xb3   :  { %v719_v62 = vcombine.low %v518_v44, %v519_v43  ;;  %v667_v63 = vcombine.low %v659_v58, %v666_v55  ;;  %v718_v5 = vcombine.low %v472_v57, %v504_v49  ;;  %4332 = vmatpush3.bf16.msra.mxu0 %v4399_v23  ;;  %v4443_v30 = vmov 1983009808  }
  0xb4   :  { %v701_v0 = vcombine.low %v692_v60, %v699_v56  ;;  %v700_v6 = vcombine.low %v678_v61, %v685_v59  ;;  %v748_v9 = vrot.slane %v720_v3, %v4540_v36  ;;  %v727_v11 = vrot.slane %v4091_v4, %v4540_v36  ;;  %4361 = vmatprep.subr.bf16.mxu0 %v5656_v2 }
  0xb5   :  { %v741_v8 = vrot.slane %v719_v62, %v4540_v36  ;;  %v734_v12 = vrot.slane %v718_v5, %v4540_v36  ;;  %v904_v24 = vunpack.c.l.s4 %v4443_v30  ;;  %vm1500_vm5 = vsmask.f32 2312 }
  0xb6   :  { %v715_v7 = vrot.slane %v701_v0, %v4540_v36  ;;  %v708_v10 = vrot.slane %v700_v6, %v4540_v36  ;;  %vm1502_vm6 = vsmask.f32 3340  ;;  %vm1501_vm7 = vmor %vm1499_vm4, %vm1500_vm5  ;;  %vm1504_vm8 = vsmask.f32 4368 }
  0xb7   :  { %v750_v14 = vcombine.low %v741_v8, %v748_v9  ;;  %v749_v15 = vcombine.low %v727_v11, %v734_v12  ;;  %v905_v25 = vunpack.c.0.s8 %v904_v24  ;;  %vm1503_vm9 = vmor %vm1501_vm7, %vm1502_vm6  ;;  %vm1506_vm10 = vsmask.f32 5396 }
  0xb8   :  { %4270 = vmatmul.mubr.bf16.gmra.mxu0 %v667_v63  ;;  %v716_v13 = vcombine.low %v708_v10, %v715_v7  ;;  %vm1505_vm11 = vmor %vm1503_vm9, %vm1504_vm8  ;;  %vm1508_vm12 = vsmask.f32 6424  ;;  %vm1510_vm14 = vsmask.f32 7452  ;;  %vm3956_vm4 = vcmask 1042434  }
  0xb9   :  { %4273 = vmatprep.mubr.msk.bf16.mxu0 %vm4441_vm0, %v5656_v2  ;;  %v764_v16 = vrot.slane %v750_v14, %v4540_v36  ;;  %v757_v17 = vrot.slane %v749_v15, %v4540_v36  ;;  %v4686_v26 = vsub.s32 %v905_v25, %v4483_v1  ;;  %vm4725_vm13 = vmor %vm1505_vm11, %vm1506_vm10  ;;  %vm3958_vm5 = vcmask 1043459  }
  0xba   :  { %vm1509_vm15 = vmor %vm4725_vm13, %vm1508_vm12  ;;  %vm3960_vm6 = vcmask 1044484   ;;  %vm3962_vm7 = vcmask 1045509   ;;  %vm3964_vm8 = vcmask 1046534   ;;  %vm3966_vm9 = vcmask 1047559  }
  0xbb   :  { %v765_v18 = vcombine.low %v757_v17, %v764_v16  ;;  %5663 = vst [vmem:[#allocation5_spill] sm:$0xff] %v4686_v26  ;;  %vm4769_vm1 = vmor %vm1509_vm15, %vm1510_vm14 }
  0xc0   :  { %4274 = vmatmul.mubr.bf16.gmra.mxu0 %v716_v13 }
  0xc1   :  { %4277 = vmatprep.mubr.msk.bf16.mxu0 %vm4441_vm0, %v5656_v2 }
  0xc8   :  { %4278 = vmatmul.mubr.bf16.gmra.mxu0 %v765_v18 }
  0xc9   :  { %4333 = vmatprep.mubr.msk.bf16.mxu0 %vm4441_vm0, %v5656_v2 }
 0x167   :  { %v853_v27 = vpop.f32.mrf.mxu0 }
 0x168   :  { %v902_v28 = vcombine.high %v853_v27, %v853_v27  ;;  %v909_v22 = vrot.slane %v853_v27, %v4686_v26 }
 0x169   :  { %v4263_v29 = vpop.f32.mrf.mxu0 }
 0x16a   :  { %v916_v31 = vrot.slane %v902_v28, %v4686_v26  ;;  %v917_v32 = vcombine.high %v909_v22, %v909_v22 }
 0x16b   :  { %v856_v33 = vpop.f32.mrf.mxu0 }
 0x16c   :  { %v918_v34 = vcombine.high %v916_v31, %v916_v31  ;;  %v1072_v35 = vcombine.low %v909_v22, %v917_v32  ;;  %v919_v37 = vcombine.high %v856_v33, %v856_v33  ;;  %v926_v38 = vrot.slane %v856_v33, %v4686_v26 }
 0x16d   :  { %v4264_v39 = vpop.f32.mrf.mxu0 }
 0x16e   :  { %v1073_v40 = vcombine.low %v916_v31, %v918_v34  ;;  %v933_v41 = vrot.slane %v919_v37, %v4686_v26  ;;  %v934_v1 = vcombine.high %v926_v38, %v926_v38  ;;  %v1095_v42 = vrot.slane %v926_v38, %v4686_v26 }
 0x16f   :  { %v1080_v44 = vrot.slane %v1072_v35, %v4686_v26 }
 0x170   :  { %v1087_v45 = vrot.slane %v1073_v40, %v4686_v26  ;;  %v861_v46 = vpop.f32.mrf.mxu0  ;;  %v935_v47 = vcombine.high %v933_v41, %v933_v41  ;;  %v1096_v48 = vcombine.low %v934_v1, %v933_v41  ;;  %v4155_v52 = vpack.c.bf16 %v1095_v42, %v1095_v42 }
 0x171   :  { %v936_v49 = vcombine.high %v861_v46, %v861_v46  ;;  %v943_v50 = vrot.slane %v861_v46, %v4686_v26 }
 0x172   :  { %v1088_v51 = vcombine.low %v1080_v44, %v1087_v45  ;;  %v4267_v53 = vpop.f32.mrf.mxu0  ;;  %v1104_v58 = vrot.slane %v1096_v48, %v4686_v26  ;;  %v2693_v63 = vrot.slane %v4155_v52, %v4540_v36 }
 0x173   :  { %v950_v43 = vrot.slane %v936_v49, %v4686_v26  ;;  %v951_v54 = vcombine.high %v943_v50, %v943_v50  ;;  %v1097_v55 = vcombine.low %v935_v47, %v943_v50 }
 0x174   :  { %v1280_v56 = vpack.c.bf16 %v1095_v42, %v1088_v51  ;;  %v864_v57 = vpop.f32.mrf.mxu0  ;;  %v4709_v14 = vrot.slane %v2693_v63, %v4540_v36 }
 0x175   :  { %v952_v59 = vcombine.high %v950_v43, %v950_v43  ;;  %v1111_v60 = vrot.slane %v1097_v55, %v4686_v26  ;;  %v1119_v61 = vrot.slane %v951_v54, %v4686_v26  ;;  %v953_v0 = vcombine.high %v864_v57, %v864_v57 }
 0x176   :  { %v1311_v62 = vrot.slane %v1280_v56, %v4540_v36  ;;  %v960_v3 = vrot.slane %v864_v57, %v4686_v26  ;;  %v4268_v4 = vpop.f32.mrf.mxu0  ;;  %v2811_v29 = vshll.u32 %v4709_v14, 16 }
 0x177   :  { %v1112_v5 = vcombine.low %v1104_v58, %v1111_v60  ;;  %v4156_v6 = vpack.c.bf16 %v1119_v61, %v1119_v61  ;;  %v1120_v8 = vcombine.low %v950_v43, %v952_v59  ;;  %v967_v9 = vrot.slane %v953_v0, %v4686_v26 }
 0x178   :  { %v1312_v7 = vcombine.high %v1311_v62, %v1311_v62  ;;  %v968_v10 = vcombine.high %v960_v3, %v960_v3  ;;  %v869_v11 = vpop.f32.mrf.mxu0  ;;  %v4712_v17 = vrot.slane %v1311_v62, %v4540_v36 }
 0x179   :  { %v1281_v12 = vpack.c.bf16 %v1119_v61, %v1112_v5  ;;  %v2708_v19 = vrot.slane %v4156_v6, %v4540_v36  ;;  %v1143_v20 = vrot.slane %v967_v9, %v4686_v26  ;;  %v1128_v21 = vrot.slane %v1120_v8, %v4686_v26 }
 0x17a   :  { %v4706_v13 = vrot.slane %v1312_v7, %v4540_v36  ;;  %v1121_v15 = vcombine.low %v960_v3, %v968_v10  ;;  %v4271_v16 = vpop.f32.mrf.mxu0  ;;  %v970_v28 = vcombine.high %v869_v11, %v869_v11  ;;  %v969_v32 = vcombine.high %v967_v9, %v967_v9 }
 0x17b   :  { %v1335_v18 = vrot.slane %v1281_v12, %v4540_v36  ;;  %v4157_v27 = vpack.c.bf16 %v1143_v20, %v1143_v20  ;;  %v4732_v34 = vcombine.high %v4712_v17, %v4712_v17  ;;  %v4741_v38 = vrot.slane %v2708_v19, %v4540_v36 }
 0x17c   :  { %v1135_v23 = vrot.slane %v1121_v15, %v4686_v26  ;;  %v872_v30 = vpop.f32.mrf.mxu0  ;;  %v4722_v24 = vcombine.high %v4706_v13, %v4706_v13  ;;  %v1513_v39 = vshrl.u32 %v4712_v17, 16  ;;  %v977_v1 = vrot.slane %v869_v11, %v4686_v26 }
 0x17d   :  { %v1336_v25 = vcombine.high %v1335_v18, %v1335_v18  ;;  %v4735_v35 = vrot.slane %v1335_v18, %v4540_v36  ;;  %v2723_v41 = vrot.slane %v4157_v27, %v4540_v36  ;;  %v984_v47 = vrot.slane %v970_v28, %v4686_v26 }
 0x17e   :  { %v1136_v31 = vcombine.low %v1128_v21, %v1135_v23  ;;  %v4272_v33 = vpop.f32.mrf.mxu0  ;;  %v2806_v44 = vshrl.u32 %v4722_v24, 16  ;;  %v985_v50 = vcombine.high %v977_v1, %v977_v1  ;;  %v1144_v51 = vcombine.low %v969_v32, %v977_v1 }
 0x17f   :  { %v4738_v37 = vrot.slane %v1336_v25, %v4540_v36  ;;  %v4759_v49 = vrot.slane %v2723_v41, %v4540_v36  ;;  %v4763_v53 = vcombine.high %v4735_v35, %v4735_v35  ;;  %v2819_v43 = vshll.u32 %v4741_v38, 16 }
 0x180   :  { %v1282_v40 = vpack.c.bf16 %v1143_v20, %v1136_v31  ;;  %v877_v42 = vpop.f32.mrf.mxu0  ;;  %v986_v55 = vcombine.high %v984_v47, %v984_v47  ;;  %v1145_v60 = vcombine.low %v985_v50, %v984_v47  ;;  %v4779_v62 = vsel %vm4769_vm1, %v2806_v44, %v2811_v29 }
 0x181   :  { %v4752_v45 = vcombine.high %v4738_v37, %v4738_v37  ;;  %v1538_v63 = vshrl.u32 %v4735_v35, 16  ;;  %v1152_v6 = vrot.slane %v1144_v51, %v4686_v26  ;;  %v987_v10 = vcombine.high %v872_v30, %v872_v30 }
 0x182   :  { %v1359_v48 = vrot.slane %v1282_v40, %v4540_v36  ;;  %v4275_v52 = vpop.f32.mrf.mxu0  ;;  %v1167_v3 = vrot.slane %v986_v55, %v4686_v26  ;;  %v1159_v7 = vrot.slane %v1145_v60, %v4686_v26  ;;  %v994_v11 = vrot.slane %v872_v30, %v4686_v26 }
 0x183   :  { %v2814_v57 = vshrl.u32 %v4752_v45, 16  ;;  %v1004_v12 = vcombine.high %v877_v42, %v877_v42  ;;  %v1011_v19 = vrot.slane %v877_v42, %v4686_v26  ;;  %v1001_v23 = vrot.slane %v987_v10, %v4686_v26 }
 0x184   :  { %v1360_v58 = vcombine.high %v1359_v48, %v1359_v48  ;;  %v4775_v59 = vrot.slane %v1359_v48, %v4540_v36  ;;  %v880_v61 = vpop.f32.mrf.mxu0  ;;  %v4158_v9 = vpack.c.bf16 %v1167_v3, %v1167_v3  ;;  %v1160_v18 = vcombine.low %v1152_v6, %v1159_v7 }
 0x185   :  { %v4794_v15 = vsel %vm4769_vm1, %v2814_v57, %v2819_v43  ;;  %v1002_v25 = vcombine.high %v994_v11, %v994_v11  ;;  %v1018_v30 = vrot.slane %v1004_v12, %v4686_v26  ;;  %v1019_v29 = vcombine.high %v1011_v19, %v1011_v19 }
 0x186   :  { %v4786_v4 = vrot.slane %v1360_v58, %v4540_v36  ;;  %v4276_v8 = vpop.f32.mrf.mxu0  ;;  %v4798_v16 = vcombine.high %v4775_v59, %v4775_v59  ;;  %v2738_v21 = vrot.slane %v4158_v9, %v4540_v36  ;;  %v1563_v27 = vshrl.u32 %v4775_v59, 16 }
 0x187   :  { %v1283_v22 = vpack.c.bf16 %v1167_v3, %v1160_v18  ;;  %v1003_v33 = vcombine.high %v1001_v23, %v1001_v23  ;;  %v1168_v40 = vcombine.low %v994_v11, %v1002_v25  ;;  %v1191_v41 = vrot.slane %v1011_v19, %v4686_v26 }
 0x188   :  { %v885_v20 = vpop.f32.mrf.mxu0  ;;  %v4808_v32 = vrot.slane %v2738_v21, %v4540_v36  ;;  %v1192_v42 = vcombine.low %v1019_v29, %v1018_v30  ;;  %v1020_v44 = vcombine.high %v1018_v30, %v1018_v30  ;;  %v1021_v47 = vcombine.high %v880_v61, %v880_v61 }
 0x189   :  { %v1383_v1 = vrot.slane %v1283_v22, %v4540_v36  ;;  %v1169_v51 = vcombine.low %v1001_v23, %v1003_v33  ;;  %v1176_v52 = vrot.slane %v1168_v40, %v4686_v26  ;;  %v4159_v43 = vpack.c.bf16 %v1191_v41, %v1191_v41 }
 0x18a   :  { %v4279_v31 = vpop.f32.mrf.mxu0  ;;  %v1200_v58 = vrot.slane %v1192_v42, %v4686_v26  ;;  %v1028_v60 = vrot.slane %v880_v61, %v4686_v26  ;;  %v1035_v8 = vrot.slane %v1021_v47, %v4686_v26  ;;  %v1038_v9 = vcombine.high %v885_v20, %v885_v20 }
 0x18b   :  { %v1384_v55 = vcombine.high %v1383_v1, %v1383_v1  ;;  %v4815_v57 = vrot.slane %v1383_v1, %v4540_v36  ;;  %v1183_v6 = vrot.slane %v1169_v51, %v4686_v26  ;;  %v2753_v7 = vrot.slane %v4159_v43, %v4540_v36 }
 0x18c   :  { %v888_v48 = vpop.f32.mrf.mxu0  ;;  %v1036_v12 = vcombine.high %v1028_v60, %v1028_v60  ;;  %v1193_v18 = vcombine.low %v1020_v44, %v1028_v60  ;;  %v1037_v21 = vcombine.high %v1035_v8, %v1035_v8  ;;  %v1045_v23 = vrot.slane %v885_v20, %v4686_v26 }
 0x18d   :  { %v4823_v10 = vrot.slane %v1384_v55, %v4540_v36  ;;  %v4827_v11 = vcombine.high %v4815_v57, %v4815_v57  ;;  %v1184_v19 = vcombine.low %v1176_v52, %v1183_v6  ;;  %v4830_v61 = vrot.slane %v2753_v7, %v4540_v36 }
 0x18e   :  { %v4280_v3 = vpop.f32.mrf.mxu0  ;;  %v1207_v25 = vrot.slane %v1193_v18, %v4686_v26  ;;  %v1215_v30 = vrot.slane %v1036_v12, %v4686_v26  ;;  %v1052_v22 = vrot.slane %v1038_v9, %v4686_v26  ;;  %v1055_v29 = vcombine.high %v888_v48, %v888_v48 }
 0x18f   :  { %5668 = vst [vmem:[#allocation6_spill] sm:$0xff] %v4830_v61  ;;  %v1284_v31 = vpack.c.bf16 %v1191_v41, %v1184_v19  ;;  %v2843_v33 = vshll.u32 %v4830_v61, 16  ;;  %v1216_v40 = vcombine.low %v1035_v8, %v1037_v21  ;;  %v1053_v1 = vcombine.high %v1045_v23, %v1045_v23 }
 0x190   :  { %v1208_v42 = vcombine.low %v1200_v58, %v1207_v25  ;;  %v4160_v44 = vpack.c.bf16 %v1215_v30, %v1215_v30  ;;  %v1239_v47 = vrot.slane %v1052_v22, %v4686_v26  ;;  %v1054_v51 = vcombine.high %v1052_v22, %v1052_v22 }
 0x191   :  { %v1407_v52 = vrot.slane %v1284_v31, %v4540_v36  ;;  %v1224_v20 = vrot.slane %v1216_v40, %v4686_v26  ;;  %v1217_v43 = vcombine.low %v1045_v23, %v1053_v1  ;;  %v1062_v55 = vrot.slane %v888_v48, %v4686_v26 }
 0x192   :  { %v1285_v60 = vpack.c.bf16 %v1215_v30, %v1208_v42  ;;  %v2768_v3 = vrot.slane %v4160_v44, %v4540_v36  ;;  %v4161_v41 = vpack.c.bf16 %v1239_v47, %v1239_v47  ;;  %v1069_v6 = vrot.slane %v1055_v29, %v4686_v26 }
 0x193   :  { %v1408_v7 = vcombine.high %v1407_v52, %v1407_v52  ;;  %v4844_v58 = vrot.slane %v1407_v52, %v4540_v36  ;;  %v1231_v8 = vrot.slane %v1217_v43, %v4686_v26  ;;  %v1070_v9 = vcombine.high %v1062_v55, %v1062_v55 }
 0x194   :  { %v1431_v12 = vrot.slane %v1285_v60, %v4540_v36  ;;  %v4849_v18 = vrot.slane %v2768_v3, %v4540_v36  ;;  %v2783_v48 = vrot.slane %v4161_v41, %v4540_v36  ;;  %v1071_v19 = vcombine.high %v1069_v6, %v1069_v6 }
 0x195   :  { %v4853_v21 = vrot.slane %v1408_v7, %v4540_v36  ;;  %v4857_v23 = vcombine.high %v4844_v58, %v4844_v58  ;;  %v1232_v30 = vcombine.low %v1224_v20, %v1231_v8  ;;  %v1240_v44 = vcombine.low %v1054_v51, %v1062_v55 }
 0x196   :  { %v1432_v22 = vcombine.high %v1431_v12, %v1431_v12  ;;  %v4861_v29 = vrot.slane %v1431_v12, %v4540_v36  ;;  %v4865_v40 = vrot.slane %v2783_v48, %v4540_v36  ;;  %v1241_v52 = vcombine.low %v1070_v9, %v1069_v6 }
 0x197   :  { %v4869_v1 = vcombine.high %v4853_v21, %v4853_v21  ;;  %v1286_v42 = vpack.c.bf16 %v1239_v47, %v1232_v30  ;;  %v1248_v8 = vrot.slane %v1240_v44, %v4686_v26  ;;  %v1263_v55 = vrot.slane %v1071_v19, %v4686_v26 }
 0x198   :  { %v4872_v43 = vrot.slane %v1432_v22, %v4540_v36  ;;  %v4876_v20 = vcombine.high %v4861_v29, %v4861_v29  ;;  %v1255_v47 = vrot.slane %v1241_v52, %v4686_v26  ;;  %v4891_v6 = vcombine.high %v4786_v4, %v4786_v4 }
 0x199   :  { %5669 = vst [vmem:[#allocation7_spill] sm:$0xff] %v4869_v1  ;;  %v2838_v41 = vshrl.u32 %v4869_v1, 16  ;;  %v1455_v7 = vrot.slane %v1286_v42, %v4540_v36  ;;  %v1518_v9 = vshll.u32 %v4706_v13, 16  ;;  %v4162_v44 = vpack.c.bf16 %v1263_v55, %v1263_v55 }
 0x19a   :  { %v4886_v51 = vcombine.high %v4872_v43, %v4872_v43  ;;  %5670 = vst [vmem:[#allocation8_spill] sm:$0xff] %v4891_v6  ;;  %v1256_v22 = vcombine.low %v1248_v8, %v1255_v47  ;;  %v1521_v52 = vshrl.u32 %v4706_v13, 16  ;;  %v1526_v47 = vshll.u32 %v4732_v34, 16 }
 0x19b   :  { %v4896_v12 = vsel %vm4769_vm1, %v2838_v41, %v2843_v33  ;;  %v1456_v48 = vcombine.high %v1455_v7, %v1455_v7  ;;  %v4899_v30 = vrot.slane %v1455_v7, %v4540_v36  ;;  %v1520_v19 = vsel %vm4769_vm1, %v1513_v39, %v1518_v9 }
 0x19c   :  { %v1287_v7 = vpack.c.bf16 %v1263_v55, %v1256_v22  ;;  %v2798_v8 = vrot.slane %v4162_v44, %v4540_v36  ;;  %v1529_v42 = vshrl.u32 %v4732_v34, 16  ;;  %v1534_v39 = vshll.u32 %v4722_v24, 16 }
 0x19d   :  { %v4909_v54 = vrot.slane %v1456_v48, %v4540_v36  ;;  %v4913_v33 = vcombine.high %v4899_v30, %v4899_v30  ;;  %v1543_v48 = vshll.u32 %v4738_v37, 16  ;;  %v1546_v46 = vshrl.u32 %v4738_v37, 16 }
 0x19e   :  { %v1479_v9 = vrot.slane %v1287_v7, %v4540_v36  ;;  %v1551_v0 = vshll.u32 %v4763_v53, 16  ;;  %v4925_v28 = vrot.slane %v2798_v8, %v4540_v36  ;;  %v1528_v55 = vsel %vm4769_vm1, %v1521_v52, %v1526_v47 }
 0x19f   :  { %v1536_v22 = vsel %vm4769_vm1, %v1529_v42, %v1534_v39  ;;  %v1554_v44 = vshrl.u32 %v4763_v53, 16  ;;  %v1545_v31 = vsel %vm4769_vm1, %v1538_v63, %v1543_v48  ;;  %v1559_v52 = vshll.u32 %v4752_v45, 16 }
 0x1a0   :  { %v1480_v3 = vcombine.high %v1479_v9, %v1479_v9  ;;  %v4933_v7 = vrot.slane %v1479_v9, %v4540_v36  ;;  %v1553_v8 = vsel %vm4769_vm1, %v1546_v46, %v1551_v0  ;;  %v1568_v42 = vshll.u32 %v4786_v4, 16 }
 0x1a1   :  { %v1571_v47 = vshrl.u32 %v4786_v4, 16  ;;  %v1576_v63 = vshll.u32 %v4798_v16, 16  ;;  %v1579_v48 = vshrl.u32 %v4798_v16, 16  ;;  %v1561_v46 = vsel %vm4769_vm1, %v1554_v44, %v1559_v52 }
 0x1a2   :  { %v4946_v39 = vrot.slane %v1480_v3, %v4540_v36  ;;  %v4950_v9 = vcombine.high %v4933_v7, %v4933_v7  ;;  %v1570_v0 = vsel %vm4769_vm1, %v1563_v27, %v1568_v42  ;;  %v1584_v41 = vshll.u32 %v4891_v6, 16 }
 0x1a3   :  { %v1712_v3 = vcombine.low %v1520_v19, %v1528_v55  ;;  %v1578_v50 = vsel %vm4769_vm1, %v1571_v47, %v1576_v63  ;;  %v1713_v5 = vcombine.low %v1536_v22, %v1545_v31  ;;  %v1714_v2 = vcombine.low %v1553_v8, %v1561_v46 }
 0x1a4   :  { %v2870_v60 = vcombine.low %v1528_v55, %v1536_v22  ;;  %v1586_v25 = vsel %vm4769_vm1, %v1579_v48, %v1584_v41  ;;  %v1715_v26 = vcombine.low %v1570_v0, %v1578_v50  ;;  %v2871_v52 = vcombine.low %v4779_v62, %v1553_v8 }
 0x1a5   :  { %v1722_v44 = vrot.slane %v1712_v3, %v4540_v36  ;;  %v1729_v27 = vrot.slane %v1713_v5, %v4540_v36  ;;  %v1736_v42 = vrot.slane %v1714_v2, %v4540_v36  ;;  %v2872_v19 = vcombine.low %v1561_v46, %v4794_v15 }
 0x1a6   :  { %v2873_v61 = vcombine.low %v1578_v50, %v1586_v25  ;;  %v1743_v31 = vrot.slane %v1715_v26, %v4540_v36  ;;  %v2880_v47 = vrot.slane %v2870_v60, %v4540_v36  ;;  %v2887_v55 = vrot.slane %v2871_v52, %v4540_v36 }
 0x1a7   :  { %v4975_v41 = vcombine.high %v4823_v10, %v4823_v10  ;;  %v1744_v22 = vcombine.low %v1722_v44, %v1729_v27  ;;  %v2894_v62 = vrot.slane %v2872_v19, %v4540_v36  ;;  %v1588_v2 = vshrl.u32 %v4815_v57, 16  ;;  %v4400_v27 = vld [vmem:[%s5651_s2 + $0x8] sm:$0xff]  }
 0x1a8   :  { %v2901_v5 = vrot.slane %v2873_v61, %v4540_v36  ;;  %v1745_v8 = vcombine.low %v1736_v42, %v1743_v31  ;;  %v2902_v15 = vcombine.low %v2880_v47, %v2887_v55  ;;  %v1593_v50 = vshll.u32 %v4823_v10, 16 }
 0x1a9   :  { %v1596_v26 = vshrl.u32 %v4823_v10, 16  ;;  %v1752_v60 = vrot.slane %v1744_v22, %v4540_v36  ;;  %v1601_v48 = vshll.u32 %v4827_v11, 16  ;;  %v1604_v46 = vshrl.u32 %v4827_v11, 16 }
 0x1aa   :  { %v2903_v63 = vcombine.low %v2894_v62, %v2901_v5  ;;  %v1759_v0 = vrot.slane %v1745_v8, %v4540_v36  ;;  %v2910_v3 = vrot.slane %v2902_v15, %v4540_v36  ;;  %v1595_v61 = vsel %vm4769_vm1, %v1588_v2, %v1593_v50 }
 0x1ab   :  { %v1609_v44 = vshll.u32 %v4975_v41, 16  ;;  %v1603_v42 = vsel %vm4769_vm1, %v1596_v26, %v1601_v48  ;;  %v1618_v19 = vshll.u32 %v4853_v21, 16  ;;  %v1621_v31 = vshrl.u32 %v4853_v21, 16 }
 0x1ac   :  { %v2917_v52 = vrot.slane %v2903_v63, %v4540_v36  ;;  %v1760_v47 = vcombine.low %v1752_v60, %v1759_v0  ;;  %v1626_v22 = vshll.u32 %v4857_v23, 16  ;;  %v1629_v62 = vshrl.u32 %v4857_v23, 16 }
 0x1ad   :  { %v1611_v55 = vsel %vm4769_vm1, %v1604_v46, %v1609_v44  ;;  %v5671_v2 = vshrl.u32 %v4844_v58, 16  ;;  %v1634_v15 = vshll.u32 %v4869_v1, 16  ;;  %v1643_v50 = vshll.u32 %v4872_v43, 16 }
 0x1ae   :  { %v2918_v5 = vcombine.low %v2910_v3, %v2917_v52  ;;  %4286 = vmatmul.mubr.msk.bf16.vlgmr.msra.gmra.mxu1 %vm1871_vm2, %v1760_v47  ;;  %v1628_v26 = vsel %vm4769_vm1, %v1621_v31, %v1626_v22  ;;  %v1761_v60 = vcombine.low %v1586_v25, %v1595_v61  ;;  %v1762_v63 = vcombine.low %v1603_v42, %v1611_v55  ;;  %v4401_v25 = vld [vmem:[%s5651_s2] sm:$0xff]  }
 0x1af   :  { %v1620_v8 = vsel %vm4769_vm1, %v5671_v2, %v1618_v19  ;;  %v1646_v48 = vshrl.u32 %v4872_v43, 16  ;;  %4298 = vmatpush3.bf16.msra.mxu1 %v4400_v27  ;;  %v1636_v46 = vsel %vm4769_vm1, %v1629_v62, %v1634_v15  ;;  %v5672_v0 = vshrl.u32 %v4861_v29, 16 }
 0x1b0   :  { %4334 = vmatmul.mubr.msk.bf16.vlgmr.msra.gmra.mxu0 %vm1871_vm2, %v2918_v5  ;;  %v1763_v44 = vcombine.low %v1620_v8, %v1628_v26  ;;  %v1651_v52 = vshll.u32 %v4876_v20, 16  ;;  %v5673_v61 = vmov 0.0   ;;  %v1771_v19 = vrot.slane %v1761_v60, %v4540_v36 }
 0x1b1   :  { %v1645_v3 = vsel %vm4769_vm1, %v5672_v0, %v1643_v50  ;;  %4289 = vmatprep.mubr.msk.bf16.mxu1 %vm4441_vm0, %v5673_v61  ;;  %4337 = vmatprep.mubr.msk.bf16.mxu0 %vm4441_vm0, %v5673_v61  ;;  %v1778_v31 = vrot.slane %v1762_v63, %v4540_v36  ;;  %v2822_v47 = vshrl.u32 %v4891_v6, 16  ;;  %v2830_v5 = vshrl.u32 %v4975_v41, 16 }
 0x1b2   :  { %v1764_v27 = vcombine.low %v1636_v46, %v1645_v3  ;;  %v1785_v22 = vrot.slane %v1763_v44, %v4540_v36  ;;  %v1653_v62 = vsel %vm4769_vm1, %v1646_v48, %v1651_v52  ;;  %v2921_v2 = vcombine.low %v1628_v26, %v1636_v46  ;;  %4299 = vmatprep.subr.bf16.mxu1 %v5673_v61 }
 0x1b3   :  { %v1793_v15 = vcombine.low %v1771_v19, %v1778_v31  ;;  %v5674_v50 = vshll.u32 %v4759_v49, 16  ;;  %v2922_v63 = vcombine.low %v4896_v12, %v1653_v62  ;;  %v5675_v0 = vshll.u32 %v4808_v32, 16  ;;  %4300 = vmatpush3.bf16.msra.mxu1 %v4401_v25 }
 0x1b4   :  { %v1792_v8 = vrot.slane %v1764_v27, %v4540_v36  ;;  %v2943_v26 = vrot.slane %v2921_v2, %v4540_v36  ;;  %v5048_v46 = vcombine.high %v4909_v54, %v4909_v54  ;;  %4313 = vmatprep.subr.bf16.mxu1 %v5673_v61  ;;  %v1654_v25 = vshrl.u32 %v4876_v20, 16 }
 0x1b5   :  { %v2829_v60 = vsel %vm4769_vm1, %v2822_v47, %v5674_v50  ;;  %v2837_v48 = vsel %vm4769_vm1, %v2830_v5, %v5675_v0  ;;  %v1801_v52 = vrot.slane %v1793_v15, %v4540_v36  ;;  %v2950_v19 = vrot.slane %v2922_v63, %v4540_v36 }
 0x1b6   :  { %v2919_v3 = vcombine.low %v2829_v60, %v1603_v42  ;;  %v1794_v44 = vcombine.low %v1785_v22, %v1792_v8  ;;  %v2920_v27 = vcombine.low %v1611_v55, %v2837_v48  ;;  %v5056_v42 = vcombine.high %v4946_v39, %v4946_v39 }
 0x1b7   :  { %v1659_v31 = vshll.u32 %v4886_v51, 16  ;;  %v2952_v5 = vcombine.low %v2943_v26, %v2950_v19  ;;  %v1668_v55 = vshll.u32 %v4909_v54, 16  ;;  %v1671_v8 = vshrl.u32 %v4909_v54, 16 }
 0x1b8   :  { %v2929_v12 = vrot.slane %v2919_v3, %v4540_v36  ;;  %v1808_v47 = vrot.slane %v1794_v44, %v4540_v36  ;;  %v2936_v22 = vrot.slane %v2920_v27, %v4540_v36  ;;  %v1676_v15 = vshll.u32 %v4913_v33, 16 }
 0x1b9   :  { %v1661_v2 = vsel %vm4769_vm1, %v1654_v25, %v1659_v31  ;;  %v1679_v50 = vshrl.u32 %v4913_v33, 16  ;;  %v2966_v0 = vrot.slane %v2952_v5, %v4540_v36  ;;  %v5676_v48 = vshrl.u32 %v4899_v30, 16 }
 0x1ba   :  { %v1809_v60 = vcombine.low %v1801_v52, %v1808_v47  ;;  %v2951_v63 = vcombine.low %v2929_v12, %v2936_v22  ;;  %v1678_v26 = vsel %vm4769_vm1, %v1671_v8, %v1676_v15  ;;  %v1684_v44 = vshll.u32 %v5048_v46, 16 }
 0x1bb   :  { %v1670_v3 = vsel %vm4769_vm1, %v5676_v48, %v1668_v55  ;;  %v1688_v27 = vshrl.u32 %v4933_v7, 16  ;;  %v1693_v19 = vshll.u32 %v4946_v39, 16  ;;  %v1696_v12 = vshrl.u32 %v4946_v39, 16 }
 0x1bc   :  { %4290 = vmatmul.mubr.msk.bf16.gmra.mxu1 %vm1871_vm2, %v1809_v60  ;;  %v2959_v52 = vrot.slane %v2951_v63, %v4540_v36  ;;  %v1701_v25 = vshll.u32 %v4950_v9, 16  ;;  %v1704_v31 = vshrl.u32 %v4950_v9, 16  ;;  %v1686_v47 = vsel %vm4769_vm1, %v1679_v50, %v1684_v44 }
 0x1bd   :  { %4293 = vmatprep.mubr.msk.bf16.mxu1 %vm4441_vm0, %v5673_v61  ;;  %v1695_v22 = vsel %vm4769_vm1, %v1688_v27, %v1693_v19  ;;  %v1709_v5 = vshll.u32 %v5056_v42, 16  ;;  %v1810_v55 = vcombine.low %v1653_v62, %v1661_v2  ;;  %v1811_v60 = vcombine.low %v1670_v3, %v1678_v26 }
 0x1be   :  { %v2967_v8 = vcombine.low %v2959_v52, %v2966_v0  ;;  %v1703_v15 = vsel %vm4769_vm1, %v1696_v12, %v1701_v25  ;;  %v1812_v63 = vcombine.low %v1686_v47, %v1695_v22  ;;  %v2846_v1 = vshrl.u32 %v4886_v51, 16 }
 0x1bf   :  { %v1711_v48 = vsel %vm4769_vm1, %v1704_v31, %v1709_v5  ;;  %v1820_v6 = vrot.slane %v1810_v55, %v4540_v36  ;;  %v2854_v50 = vshrl.u32 %v5048_v46, 16  ;;  %v1827_v62 = vrot.slane %v1811_v60, %v4540_v36 }
 0x1c0   :  { %4338 = vmatmul.mubr.msk.bf16.gmra.mxu0 %vm1871_vm2, %v2967_v8  ;;  %v1813_v44 = vcombine.low %v1703_v15, %v1711_v48  ;;  %v1834_v0 = vrot.slane %v1812_v63, %v4540_v36  ;;  %v2862_v27 = vshrl.u32 %v5056_v42, 16  ;;  %v5677_v3 = vshll.u32 %v4849_v18, 16 }
 0x1c1   :  { %4341 = vmatprep.mubr.msk.bf16.mxu0 %vm4441_vm0, %v5673_v61  ;;  %v5678_v52 = vshll.u32 %v4865_v40, 16  ;;  %v2969_v25 = vcombine.low %v1678_v26, %v1686_v47  ;;  %v1940_v31 = vcombine.low %v4738_v37, %v4763_v53  ;;  %v1842_v5 = vcombine.low %v1820_v6, %v1827_v62 }
 0x1c2   :  { %v2853_v19 = vsel %vm4769_vm1, %v2846_v1, %v5677_v3  ;;  %v1841_v22 = vrot.slane %v1813_v44, %v4540_v36  ;;  %v5679_v55 = vshll.u32 %v4925_v28, 16  ;;  %v5680_v26 = vcombine.low %v4775_v59, %v4786_v4 }
 0x1c3   :  { %v2861_v12 = vsel %vm4769_vm1, %v2854_v50, %v5678_v52  ;;  %v2968_v60 = vcombine.low %v1661_v2, %v2853_v19  ;;  %v2985_v3 = vrot.slane %v2969_v25, %v4540_v36  ;;  %v1938_v50 = vcombine.low %v4712_v17, %v4706_v13 }
 0x1c4   :  { %v2869_v8 = vsel %vm4769_vm1, %v2862_v27, %v5679_v55  ;;  %v2970_v63 = vcombine.low %v2861_v12, %v1703_v15  ;;  %v1969_v47 = vrot.slane %v5680_v26, %v4540_v36  ;;  %v1843_v44 = vcombine.low %v1834_v0, %v1841_v22 }
 0x1c5   :  { %v2971_v1 = vcombine.low %v1711_v48, %v2869_v8  ;;  %v2978_v6 = vrot.slane %v2968_v60, %v4540_v36  ;;  %v5681_v56 = vcombine.low %v4732_v34, %v4735_v35  ;;  %v1850_v62 = vrot.slane %v1842_v5, %v4540_v36 }
 0x1c6   :  { %v2992_v15 = vrot.slane %v2970_v63, %v4540_v36  ;;  %v1857_v27 = vrot.slane %v1843_v44, %v4540_v36  ;;  %v1962_v52 = vrot.slane %v1940_v31, %v4540_v36  ;;  %v1948_v0 = vrot.slane %v1938_v50, %v4540_v36 }
 0x1c7   :  { %v1955_v2 = vrot.slane %v5681_v56, %v4540_v36  ;;  %v2999_v48 = vrot.slane %v2971_v1, %v4540_v36  ;;  %v3000_v19 = vcombine.low %v2978_v6, %v2985_v3  ;;  %v1990_v55 = vcombine.low %v4857_v23, %v4861_v29 }
 0x1c8   :  { %v1858_v25 = vcombine.low %v1850_v62, %v1857_v27  ;;  %v1971_v22 = vcombine.low %v1962_v52, %v1969_v47  ;;  %v1988_v63 = vcombine.low %v4823_v10, %v4827_v11  ;;  %v1989_v31 = vcombine.low %v4844_v58, %v4853_v21 }
 0x1c9   :  { %v3001_v12 = vcombine.low %v2992_v15, %v2999_v48  ;;  %v3008_v8 = vrot.slane %v3000_v19, %v4540_v36  ;;  %v1970_v5 = vcombine.low %v1948_v0, %v1955_v2  ;;  %v2300_v3 = vcombine.low %v4706_v13, %v4732_v34 }
 0x1ca   :  { %4294 = vmatmul.mubr.msk.bf16.gmra.mxu1 %vm1871_vm2, %v1858_v25  ;;  %v1985_v50 = vrot.slane %v1971_v22, %v4540_v36  ;;  %v1987_v26 = vcombine.low %v4798_v16, %v4815_v57  ;;  %v2018_v47 = vrot.slane %v1990_v55, %v4540_v36  ;;  %v4181_v44 = vcombine.high %v4775_v59, %v4786_v4 }
 0x1cb   :  { %v3015_v60 = vrot.slane %v3001_v12, %v4540_v36  ;;  %4301 = vmatprep.mubr.msk.bf16.mxu1 %vm4441_vm0, %v5673_v61  ;;  %v2301_v6 = vcombine.low %v4722_v24, %v4738_v37  ;;  %v2303_v56 = vcombine.low %v4786_v4, %v4798_v16  ;;  %v1978_v34 = vrot.slane %v1970_v5, %v4540_v36  ;;  %v4402_v24 = vld [vmem:[%s5651_s2 + $0x28] sm:$0xff]  }
 0x1cc   :  { %v2004_v2 = vrot.slane %v1988_v63, %v4540_v36  ;;  %v2011_v15 = vrot.slane %v1989_v31, %v4540_v36  ;;  %v5682_v59 = vcombine.high %v4735_v35, %v4738_v37  ;;  %v2310_v4 = vrot.slane %v2300_v3, %v4540_v36 }
 0x1cd   :  { %v3016_v1 = vcombine.low %v3008_v8, %v3015_v60  ;;  %v2317_v16 = vrot.slane %v2301_v6, %v4540_v36  ;;  %v2331_v62 = vrot.slane %v2303_v56, %v4540_v36  ;;  %v1986_v27 = vcombine.low %v1978_v34, %v1985_v50 }
 0x1ce   :  { %v2324_v48 = vrot.slane %v5682_v59, %v4540_v36  ;;  %v1997_v19 = vrot.slane %v1987_v26, %v4540_v36  ;;  %v2020_v52 = vcombine.low %v2011_v15, %v2018_v47  ;;  %v2039_v12 = vcombine.low %v4946_v39, %v4950_v9 }
 0x1cf   :  { %4342 = vmatmul.mubr.msk.bf16.gmra.mxu0 %vm1871_vm2, %v3016_v1  ;;  %v4180_v35 = vcombine.high %v4712_v17, %v4706_v13  ;;  %v3287_v37 = vrot.slane %v4181_v44, %v4540_v36  ;;  %v2332_v0 = vcombine.low %v2310_v4, %v2317_v16  ;;  %v2037_v55 = vcombine.low %v4899_v30, %v4909_v54  ;;  %v4403_v13 = vld [vmem:[%s5651_s2 + $0x20] sm:$0xff]   ;;  %v5684_v16 = vld [vmem:[#allocation6_spill] sm:$0xff] }
 0x1d0   :  { %4377 = vmatprep.mubr.msk.bf16.mxu0 %vm4441_vm0, %v5673_v61  ;;  %v2333_v25 = vcombine.low %v2324_v48, %v2331_v62  ;;  %v2019_v22 = vcombine.low %v1997_v19, %v2004_v2  ;;  %v2038_v8 = vcombine.low %v4913_v33, %v4933_v7  ;;  %v4144_v60 = vcombine.high %v4861_v29, %v4872_v43 }
 0x1d1   :  { %v2036_v17 = vcombine.low %v4872_v43, %v4876_v20  ;;  %v5196_v5 = vrot.slane %v2332_v0, %v4540_v36  ;;  %v2034_v31 = vrot.slane %v2020_v52, %v4540_v36  ;;  %v2067_v1 = vrot.slane %v2039_v12, %v4540_v36 }
 0x1d2   :  { %4302 = vmatmul.mubr.msk.bf16.vlgmr.msra.gmra.mxu1 %vm1871_vm2, %v1986_v27  ;;  %v5199_v63 = vrot.slane %v2333_v25, %v4540_v36  ;;  %v5683_v3 = vcombine.low %v4752_v45, %v4741_v38  ;;  %v3257_v47 = vcombine.low %v4709_v14, %v4763_v53  ;;  %v3266_v44 = vrot.slane %v4180_v35, %v4540_v36 }
 0x1d3   :  { %4314 = vmatpush3.bf16.msra.mxu1 %v4402_v24  ;;  %4305 = vmatprep.mubr.msk.bf16.mxu1 %vm4441_vm0, %v5673_v61  ;;  %v2027_v6 = vrot.slane %v2019_v22, %v4540_v36  ;;  %v2053_v56 = vrot.slane %v2037_v55, %v4540_v36  ;;  %v2060_v34 = vrot.slane %v2038_v8, %v4540_v36 }
 0x1d4   :  { %4315 = vmatprep.subr.bf16.mxu1 %v5673_v61  ;;  %v3280_v50 = vrot.slane %v5683_v3, %v4540_v36  ;;  %v2348_v26 = vcombine.low %v5196_v5, %v5199_v63  ;;  %v2046_v2 = vrot.slane %v2036_v17, %v4540_v36  ;;  %v3273_v38 = vrot.slane %v3257_v47, %v4540_v36  ;;  %v5686_v17 = vld [vmem:[#allocation7_spill] sm:$0xff] }
 0x1d5   :  { %v3305_v15 = vcombine.low %v4759_v49, %v4827_v11  ;;  %v2035_v59 = vcombine.low %v2027_v6, %v2034_v31  ;;  %v2069_v48 = vcombine.low %v2060_v34, %v2067_v1  ;;  %v3306_v14 = vcombine.low %v4975_v41, %v4808_v32 }
 0x1d6   :  { %v3289_v45 = vcombine.low %v3280_v50, %v3287_v37  ;;  %v4182_v53 = vcombine.high %v4844_v58, %v4853_v21  ;;  %v3288_v24 = vcombine.low %v3266_v44, %v3273_v38  ;;  %v3308_v62 = vcombine.low %v5684_v16, %v4876_v20 }
 0x1d7   :  { %4316 = vmatpush3.bf16.msra.mxu1 %v4403_v13  ;;  %v2068_v49 = vcombine.low %v2046_v2, %v2053_v56  ;;  %v3315_v11 = vrot.slane %v3305_v15, %v4540_v36  ;;  %v3322_v27 = vrot.slane %v3306_v14, %v4540_v36  ;;  %v4183_v41 = vcombine.high %v4899_v30, %v4909_v54  ;;  %v4405_v15 = vld [vmem:[%s5651_s2 + $0x40] sm:$0xff]  }
 0x1d8   :  { %4345 = vmatprep.subr.bf16.mxu1 %v5673_v61  ;;  %v5226_v4 = vrot.slane %v3289_v45, %v4540_v36  ;;  %v3329_v19 = vrot.slane %v4182_v53, %v4540_v36  ;;  %v3296_v32 = vrot.slane %v3288_v24, %v4540_v36  ;;  %v3336_v58 = vrot.slane %v3308_v62, %v4540_v36 }
 0x1d9   :  { %v3356_v20 = vcombine.low %v4865_v40, %v4950_v9  ;;  %v2083_v52 = vrot.slane %v2069_v48, %v4540_v36  ;;  %v3337_v12 = vcombine.low %v3315_v11, %v3322_v27  ;;  %v3357_v35 = vcombine.low %v5056_v42, %v4925_v28 }
 0x1da   :  { %4306 = vmatmul.mubr.msk.bf16.gmra.mxu1 %vm1871_vm2, %v2035_v59  ;;  %v3304_v37 = vcombine.low %v3296_v32, %v5226_v4  ;;  %v3338_v0 = vcombine.low %v3329_v19, %v3336_v58  ;;  %v5685_v25 = vcombine.low %v4886_v51, %v4849_v18  ;;  %v3371_v55 = vrot.slane %v4183_v41, %v4540_v36  ;;  %v5687_v18 = vld [vmem:[#allocation8_spill] sm:$0xff] }
 0x1db   :  { %4309 = vmatprep.mubr.msk.bf16.mxu1 %vm4441_vm0, %v5673_v61  ;;  %v2076_v30 = vrot.slane %v2068_v49, %v4540_v36  ;;  %v3378_v40 = vrot.slane %v3356_v20, %v4540_v36  ;;  %v3385_v9 = vrot.slane %v3357_v35, %v4540_v36  ;;  %v3345_v8 = vrot.slane %v3337_v12, %v4540_v36  ;;  %v4408_v35 = vld [vmem:[#allocation2 + $0x30] sm:$0xff]  }
 0x1dc   :  { %v3364_v22 = vrot.slane %v5685_v25, %v4540_v36  ;;  %v3352_v28 = vrot.slane %v3338_v0, %v4540_v36  ;;  %v2352_v5 = vcombine.low %v5686_v17, %v4872_v43  ;;  %v2349_v51 = vcombine.low %v5687_v18, %v4823_v10  ;;  %v4409_v0 = vld [vmem:[#allocation2 + $0x28] sm:$0xff]   ;;  %v4412_v18 = vld [vmem:[#allocation2 + $0x10] sm:$0xff]  }
 0x1dd   :  { %v2084_v13 = vcombine.low %v2076_v30, %v2083_v52  ;;  %v3387_v63 = vcombine.low %v3378_v40, %v3385_v9  ;;  %v4143_v1 = vcombine.high %v4815_v57, %v4823_v10  ;;  %v2351_v3 = vcombine.low %v4853_v21, %v4857_v23  ;;  %v4404_v57 = vld [vmem:[%s5651_s2 + $0x48] sm:$0xff]   ;;  %v4410_v30 = vld [vmem:[#allocation2 + $0x20] sm:$0xff]  }
 0x1de   :  { %v3386_v42 = vcombine.low %v3364_v22, %v3371_v55  ;;  %v3353_v31 = vcombine.low %v3345_v8, %v3352_v28  ;;  %v2380_v44 = vrot.slane %v2352_v5, %v4540_v36  ;;  %v2359_v56 = vrot.slane %v2349_v51, %v4540_v36  ;;  %v4407_v52 = vld [vmem:[#allocation2 + $0x38] sm:$0xff]  }
 0x1df   :  { %v3401_v47 = vrot.slane %v3387_v63, %v4540_v36  ;;  %v2366_v34 = vrot.slane %v4143_v1, %v4540_v36  ;;  %v2373_v2 = vrot.slane %v2351_v3, %v4540_v36  ;;  %v2400_v21 = vcombine.low %v5048_v46, %v4946_v39  ;;  %4362 = vmatpush3.bf16.msra.mxu0 %v4407_v52  ;;  %v4413_v3 = vld [vmem:[#allocation2 + $0x8] sm:$0xff]  }
 0x1e0   :  { %v3394_v50 = vrot.slane %v3386_v42, %v4540_v36  ;;  %v4145_v23 = vcombine.high %v4933_v7, %v4946_v39  ;;  %v2399_v45 = vcombine.low %v4909_v54, %v4913_v33  ;;  %4363 = vmatprep.subr.bf16.mxu0 %v5673_v61  ;;  %v4411_v42 = vld [vmem:[#allocation2 + $0x18] sm:$0xff]  }
 0x1e1   :  { %v2382_v10 = vcombine.low %v2373_v2, %v2380_v44  ;;  %v2381_v38 = vcombine.low %v2359_v56, %v2366_v34  ;;  %v2422_v7 = vrot.slane %v2400_v21, %v4540_v36  ;;  %v4414_v56 = vld [vmem:[#allocation2] sm:$0xff]  }
 0x1e2   :  { %4310 = vmatmul.mubr.msk.bf16.gmra.mxu1 %vm1871_vm2, %v2084_v13  ;;  %v3402_v6 = vcombine.low %v3394_v50, %v3401_v47  ;;  %v2429_v39 = vrot.slane %v4145_v23, %v4540_v36  ;;  %v2415_v54 = vrot.slane %v2399_v45, %v4540_v36  ;;  %v5688_v45 = vld [vmem:[#allocation5_spill] sm:$0xff] }
 0x1e3   :  { %4317 = vmatprep.mubr.msk.bf16.mxu1 %vm4441_vm0, %v5673_v61  ;;  %v2396_v59 = vrot.slane %v2382_v10, %v4540_v36  ;;  %v2389_v46 = vrot.slane %v2381_v38, %v4540_v36  ;;  %4364 = vmatpush3.bf16.msra.mxu0 %v4408_v35 }
 0x1e4   :  { %v2431_v48 = vcombine.low %v2422_v7, %v2429_v39  ;;  %4365 = vmatprep.subr.bf16.mxu0 %v5673_v61 }
 0x1e5   :  { %v2397_v33 = vcombine.low %v2389_v46, %v2396_v59 }
 0x1e6   :  { %v2445_v53 = vrot.slane %v2431_v48, %v4540_v36 }
 0x1e7   :  { %4366 = vmatpush3.bf16.msra.mxu0 %v4409_v0 }
 0x1e8   :  { %4367 = vmatprep.subr.bf16.mxu0 %v5673_v61 }
 0x1ea   :  { %4318 = vmatmul.mubr.msk.bf16.vlgmr.msra.gmra.mxu1 %vm1871_vm2, %v2348_v26  ;;  %v2408_v26 = vrot.slane %v4144_v60, %v4540_v36 }
 0x1eb   :  { %4346 = vmatpush3.bf16.msra.mxu1 %v4404_v57  ;;  %4321 = vmatprep.mubr.msk.bf16.mxu1 %vm4441_vm0, %v5673_v61 }
 0x1ec   :  { %4347 = vmatprep.subr.bf16.mxu1 %v5673_v61  ;;  %v2430_v14 = vcombine.low %v2408_v26, %v2415_v54  ;;  %4368 = vmatpush3.bf16.msra.mxu0 %v4410_v30 }
 0x1ed   :  { %4369 = vmatprep.subr.bf16.mxu0 %v5673_v61 }
 0x1ee   :  { %v2438_v24 = vrot.slane %v2430_v14, %v4540_v36 }
 0x1ef   :  { %4348 = vmatpush3.bf16.msra.mxu1 %v4405_v15 }
 0x1f0   :  { %v2446_v4 = vcombine.low %v2438_v24, %v2445_v53  ;;  %4370 = vmatpush3.bf16.msra.mxu0 %v4411_v42 }
 0x1f1   :  { %4371 = vmatprep.subr.bf16.mxu0 %v5673_v61 }
 0x1f2   :  { %4322 = vmatmul.mubr.msk.bf16.gmra.mxu1 %vm1871_vm2, %v2397_v33 }
 0x1f3   :  { %4325 = vmatprep.mubr.msk.bf16.mxu1 %vm4441_vm0, %v5673_v61 }
 0x1f4   :  { %4372 = vmatpush3.bf16.msra.mxu0 %v4412_v18 }
 0x1f5   :  { %4373 = vmatprep.subr.bf16.mxu0 %v5673_v61 }
 0x1f8   :  { %4374 = vmatpush3.bf16.msra.mxu0 %v4413_v3 }
 0x1f9   :  { %4375 = vmatprep.subr.bf16.mxu0 %v5673_v61 }
 0x1fa   :  { %4326 = vmatmul.mubr.msk.bf16.gmra.mxu1 %vm1871_vm2, %v2446_v4 }
 0x1fb   :  { %4349 = vmatprep.mubr.msk.bf16.mxu1 %vm4441_vm0, %v5673_v61 }
 0x1fc   :  { %4376 = vmatpush3.bf16.msra.mxu0 %v4414_v56 }
 0x202   :  { %4350 = vmatmul.mubr.msk.bf16.vlgmr.msra.gmra.mxu1 %vm1871_vm2, %v3304_v37 }
 0x203   :  { %4353 = vmatprep.mubr.msk.bf16.mxu1 %vm4441_vm0, %v5673_v61 }
 0x20a   :  { %4354 = vmatmul.mubr.msk.bf16.gmra.mxu1 %vm1871_vm2, %v3353_v31 }
 0x20b   :  { %4357 = vmatprep.mubr.msk.bf16.mxu1 %vm4441_vm0, %v5673_v61  ;;  %vm3842_vm0 = vcmask 1045504  }
 0x212   :  { %4358 = vmatmul.mubr.msk.bf16.gmra.mxu1 %vm1871_vm2, %v3402_v6  ;;  %v3637_v6 = vld [vmem:[%s5652_s3] sm:$0x3f] }
 0x213   :  { %v3639_v21 = vcombine.high %v3637_v6, %v3637_v6  ;;  %v5350_v15 = vrot.slane %v3637_v6, %v5688_v45 }
 0x215   :  { %v5373_v14 = vrot.slane %v3639_v21, %v5688_v45 }
 0x26e   :  { %v1915_v29 = vpop.f32.mrf.mxu1 }
 0x270   :  { %v5313_v36 = vpop.f32.mrf.mxu0  ;;  %v4287_v43 = vpop.f32.mrf.mxu1 }
 0x271   :  { %v3101_v2 = vcombine.high %v5313_v36, %v5313_v36  ;;  %v5354_v61 = vrot.slane %v5313_v36, %v5688_v45 }
 0x272   :  { %v4335_v60 = vpop.f32.mrf.mxu0  ;;  %v1918_v16 = vpop.f32.mrf.mxu1 }
 0x273   :  { %v5357_v7 = vrot.slane %v3101_v2, %v5688_v45  ;;  %v3116_v36 = vcombine.high %v5354_v61, %v5354_v61 }
 0x274   :  { %v5315_v62 = vpop.f32.mrf.mxu0  ;;  %v4288_v49 = vpop.f32.mrf.mxu1 }
 0x275   :  { %v3118_v57 = vcombine.high %v5315_v62, %v5315_v62  ;;  %v5361_v39 = vrot.slane %v5315_v62, %v5688_v45  ;;  %v3117_v49 = vcombine.high %v5357_v7, %v5357_v7 }
 0x276   :  { %v4336_v11 = vpop.f32.mrf.mxu0 }
 0x277   :  { %v5364_v46 = vrot.slane %v3118_v57, %v5688_v45  ;;  %v3133_v11 = vcombine.high %v5361_v39, %v5361_v39 }
 0x27c   :  { %v1923_v27 = vpop.f32.mrf.mxu1 }
 0x27e   :  { %v4291_v19 = vpop.f32.mrf.mxu1 }
 0x280   :  { %v5317_v32 = vpop.f32.mrf.mxu0  ;;  %v5319_v58 = vpop.f32.mrf.mxu1 }
 0x281   :  { %v3135_v23 = vcombine.high %v5317_v32, %v5317_v32  ;;  %v5370_v33 = vrot.slane %v5317_v32, %v5688_v45 }
 0x282   :  { %v4339_v41 = vpop.f32.mrf.mxu0  ;;  %v4292_v20 = vpop.f32.mrf.mxu1 }
 0x283   :  { %v5376_v53 = vrot.slane %v3135_v23, %v5688_v45  ;;  %v3150_v32 = vcombine.high %v5370_v33, %v5370_v33 }
 0x284   :  { %v5321_v12 = vpop.f32.mrf.mxu0 }
 0x285   :  { %v3152_v38 = vcombine.high %v5321_v12, %v5321_v12  ;;  %v5380_v24 = vrot.slane %v5321_v12, %v5688_v45  ;;  %v3151_v12 = vcombine.high %v5376_v53, %v5376_v53 }
 0x286   :  { %v4340_v37 = vpop.f32.mrf.mxu0 }
 0x287   :  { %v5383_v4 = vrot.slane %v3152_v38, %v5688_v45  ;;  %v3167_v35 = vcombine.high %v5380_v24, %v5380_v24 }
 0x289   :  { %v3168_v37 = vcombine.high %v5383_v4, %v5383_v4 }
 0x28a   :  { %v5324_v25 = vpop.f32.mrf.mxu1 }
 0x28c   :  { %v4295_v22 = vpop.f32.mrf.mxu1 }
 0x28e   :  { %v5329_v40 = vpop.f32.mrf.mxu1 }
 0x28f   :  { %v5327_v55 = vpop.f32.mrf.mxu0 }
 0x290   :  { %v4296_v8 = vpop.f32.mrf.mxu1  ;;  %v3169_v54 = vcombine.high %v5327_v55, %v5327_v55  ;;  %v5393_v43 = vrot.slane %v5327_v55, %v5688_v45 }
 0x291   :  { %v4343_v9 = vpop.f32.mrf.mxu0 }
 0x292   :  { %v2140_v13 = vpop.f32.mrf.mxu1  ;;  %v5405_v19 = vrot.slane %v3169_v54, %v5688_v45  ;;  %v3184_v22 = vcombine.high %v5393_v43, %v5393_v43 }
 0x293   :  { %v5332_v28 = vpop.f32.mrf.mxu0  ;;  %v2141_v5 = vadd.f32 %v2140_v13, %v1915_v29  ;;  %v5387_v29 = vcombine.high %v5350_v15, %v5350_v15 }
 0x294   :  { %v4303_v63 = vpop.f32.mrf.mxu1  ;;  %v3185_v42 = vcombine.high %v5405_v19, %v5405_v19  ;;  %v3186_v13 = vcombine.high %v5332_v28, %v5332_v28 }
 0x295   :  { %v4344_v17 = vpop.f32.mrf.mxu0  ;;  %v2169_v26 = vcombine.high %v2141_v5, %v2141_v5  ;;  %v2176_v41 = vrot.slane %v2141_v5, %v5688_v45  ;;  %v5429_v63 = vrot.slane %v5332_v28, %v5688_v45 }
 0x296   :  { %v2143_v51 = vpop.f32.mrf.mxu1 }
 0x297   :  { %v2144_v31 = vadd.f32 %v2143_v51, %v1918_v16  ;;  %v2184_v18 = vcombine.high %v2176_v41, %v2176_v41 }
 0x298   :  { %v4304_v1 = vpop.f32.mrf.mxu1 }
 0x299   :  { %v2186_v60 = vcombine.high %v2144_v31, %v2144_v31  ;;  %v2193_v0 = vrot.slane %v2144_v31, %v5688_v45 }
 0x29a   :  { %v2148_v50 = vpop.f32.mrf.mxu1 }
 0x29b   :  { %v2149_v47 = vadd.f32 %v2148_v50, %v1923_v27  ;;  %v3134_v27 = vcombine.high %v5364_v46, %v5364_v46  ;;  %v2200_v55 = vrot.slane %v2186_v60, %v5688_v45  ;;  %v2201_v3 = vcombine.high %v2193_v0, %v2193_v0 }
 0x29c   :  { %v4307_v44 = vpop.f32.mrf.mxu1 }
 0x29d   :  { %v2203_v20 = vcombine.high %v2149_v47, %v2149_v47  ;;  %v2210_v30 = vrot.slane %v2149_v47, %v5688_v45  ;;  %v2202_v6 = vcombine.high %v2200_v55, %v2200_v55 }
 0x29e   :  { %v2151_v34 = vpop.f32.mrf.mxu1 }
 0x29f   :  { %v2152_v16 = vadd.f32 %v2151_v34, %v5319_v58  ;;  %v2183_v58 = vrot.slane %v2169_v26, %v5688_v45  ;;  %v2217_v31 = vrot.slane %v2203_v20, %v5688_v45  ;;  %v2218_v56 = vcombine.high %v2210_v30, %v2210_v30 }
 0x2a0   :  { %v4308_v10 = vpop.f32.mrf.mxu1 }
 0x2a1   :  { %v2220_v9 = vcombine.high %v2152_v16, %v2152_v16  ;;  %v2185_v51 = vcombine.high %v2183_v58, %v2183_v58  ;;  %v5434_v34 = vrot.slane %v2152_v16, %v5688_v45  ;;  %v2219_v54 = vcombine.high %v2217_v31, %v2217_v31 }
 0x2a2   :  { %v2156_v59 = vpop.f32.mrf.mxu1 }
 0x2a3   :  { %v5437_v2 = vrot.slane %v2220_v9, %v5688_v45  ;;  %v2157_v26 = vadd.f32 %v2156_v59, %v5324_v25 }
 0x2a4   :  { %v4311_v48 = vpop.f32.mrf.mxu1 }
 0x2a5   :  { %v2236_v25 = vcombine.high %v5437_v2, %v5437_v2 }
 0x2a6   :  { %v5396_v62 = vpop.f32.mrf.mxu1 }
 0x2a8   :  { %v4312_v52 = vpop.f32.mrf.mxu1 }
 0x2aa   :  { %v2502_v8 = vpop.f32.mrf.mxu1 }
 0x2ab   :  { %v2531_v17 = vcombine.high %v2502_v8, %v2502_v8  ;;  %v2538_v5 = vrot.slane %v2502_v8, %v5688_v45 }
 0x2ac   :  { %v4319_v1 = vpop.f32.mrf.mxu1 }
 0x2ad   :  { %v2545_v50 = vrot.slane %v2531_v17, %v5688_v45  ;;  %v2546_v47 = vcombine.high %v2538_v5, %v2538_v5  ;;  %v2657_v44 = vadd.f32 %v2538_v5, %v2176_v41  ;;  %v2237_v1 = vcombine.high %v2157_v26, %v2157_v26 }
 0x2ae   :  { %v2505_v57 = vpop.f32.mrf.mxu1 }
 0x2af   :  { %v2547_v10 = vcombine.high %v2545_v50, %v2545_v50  ;;  %v2658_v21 = vadd.f32 %v2546_v47, %v2184_v18  ;;  %v2659_v23 = vadd.f32 %v2545_v50, %v2183_v58  ;;  %v2548_v38 = vcombine.high %v2505_v57, %v2505_v57 }
 0x2b0   :  { %v2555_v48 = vrot.slane %v2505_v57, %v5688_v45  ;;  %v4320_v60 = vpop.f32.mrf.mxu1  ;;  %v5442_v41 = vadd.f32 %v5354_v61, %v2657_v44  ;;  %v2235_v58 = vcombine.high %v5434_v34, %v5434_v34 }
 0x2b1   :  { %v2660_v20 = vadd.f32 %v2547_v10, %v2185_v51  ;;  %v2562_v16 = vrot.slane %v2548_v38, %v5688_v45  ;;  %v5445_v52 = vadd.f32 %v3116_v36, %v2658_v21  ;;  %v5448_v9 = vadd.f32 %v5357_v7, %v2659_v23 }
 0x2b2   :  { %v2563_v59 = vcombine.high %v2555_v48, %v2555_v48  ;;  %v2661_v8 = vadd.f32 %v2555_v48, %v2193_v0  ;;  %v2510_v17 = vpop.f32.mrf.mxu1  ;;  %v2244_v0 = vrot.slane %v2157_v26, %v5688_v45 }
 0x2b3   :  { %v2564_v5 = vcombine.high %v2562_v16, %v2562_v16  ;;  %v2663_v61 = vadd.f32 %v2562_v16, %v2200_v55  ;;  %v2565_v18 = vcombine.high %v2510_v17, %v2510_v17  ;;  %v2572_v51 = vrot.slane %v2510_v17, %v5688_v45 }
 0x2b4   :  { %v2662_v36 = vadd.f32 %v2563_v59, %v2201_v3  ;;  %v4323_v50 = vpop.f32.mrf.mxu1  ;;  %v5455_v47 = vadd.f32 %v3117_v49, %v2660_v20  ;;  %v5458_v7 = vadd.f32 %v5361_v39, %v2661_v8  ;;  %v2160_v55 = vadd.f32 %v5396_v62, %v5329_v40 }
 0x2b5   :  { %v2664_v44 = vadd.f32 %v2564_v5, %v2202_v6  ;;  %v2579_v57 = vrot.slane %v2565_v18, %v5688_v45  ;;  %v2580_v10 = vcombine.high %v2572_v51, %v2572_v51  ;;  %v2665_v21 = vadd.f32 %v2572_v51, %v2210_v30 }
 0x2b6   :  { %v2513_v23 = vpop.f32.mrf.mxu1  ;;  %v5467_v3 = vadd.f32 %v3133_v11, %v2662_v36  ;;  %v5470_v49 = vadd.f32 %v5364_v46, %v2663_v61  ;;  %v2251_v30 = vrot.slane %v2237_v1, %v5688_v45  ;;  %v2252_v16 = vcombine.high %v2244_v0, %v2244_v0 }
 0x2b7   :  { %v2581_v38 = vcombine.high %v2579_v57, %v2579_v57  ;;  %v2666_v6 = vadd.f32 %v2580_v10, %v2218_v56  ;;  %v2667_v48 = vadd.f32 %v2579_v57, %v2217_v31  ;;  %v2582_v60 = vcombine.high %v2513_v23, %v2513_v23 }
 0x2b8   :  { %v2589_v26 = vrot.slane %v2513_v23, %v5688_v45  ;;  %v4324_v20 = vpop.f32.mrf.mxu1  ;;  %v5477_v40 = vadd.f32 %v3134_v27, %v2664_v44  ;;  %v5480_v39 = vadd.f32 %v5370_v33, %v2665_v21  ;;  %v2254_v59 = vcombine.high %v2160_v55, %v2160_v55 }
 0x2b9   :  { %v2668_v62 = vadd.f32 %v2581_v38, %v2219_v54  ;;  %v2596_v11 = vrot.slane %v2582_v60, %v5688_v45  ;;  %v5486_v31 = vadd.f32 %v3150_v32, %v2666_v6  ;;  %v5489_v56 = vadd.f32 %v5376_v53, %v2667_v48 }
 0x2ba   :  { %v2597_v8 = vcombine.high %v2589_v26, %v2589_v26  ;;  %v2669_v46 = vadd.f32 %v2589_v26, %v5434_v34  ;;  %v2518_v27 = vpop.f32.mrf.mxu1  ;;  %v2253_v18 = vcombine.high %v2251_v30, %v2251_v30  ;;  %v2268_v57 = vrot.slane %v2254_v59, %v5688_v45 }
 0x2bb   :  { %v2598_v17 = vcombine.high %v2596_v11, %v2596_v11  ;;  %v2671_v5 = vadd.f32 %v2596_v11, %v5437_v2  ;;  %v2599_v54 = vcombine.high %v2518_v27, %v2518_v27  ;;  %v2606_v61 = vrot.slane %v2518_v27, %v5688_v45 }
 0x2bc   :  { %v2670_v51 = vadd.f32 %v2597_v8, %v2235_v58  ;;  %v4327_v33 = vpop.f32.mrf.mxu1  ;;  %v5497_v32 = vadd.f32 %v3151_v12, %v2668_v62  ;;  %v5500_v1 = vadd.f32 %v5380_v24, %v2669_v46  ;;  %v2261_v2 = vrot.slane %v2160_v55, %v5688_v45 }
 0x2bd   :  { %v2672_v36 = vadd.f32 %v2598_v17, %v2236_v25  ;;  %v2613_v34 = vrot.slane %v2599_v54, %v5688_v45  ;;  %v2614_v50 = vcombine.high %v2606_v61, %v2606_v61  ;;  %v2673_v44 = vadd.f32 %v2606_v61, %v2244_v0 }
 0x2be   :  { %v2521_v10 = vpop.f32.mrf.mxu1  ;;  %v5508_v58 = vadd.f32 %v3167_v35, %v2670_v51  ;;  %v5511_v53 = vadd.f32 %v5383_v4, %v2671_v5  ;;  %v3200_v0 = vrot.slane %v3186_v13, %v5688_v45  ;;  %v2269_v13 = vcombine.high %v2261_v2, %v2261_v2 }
 0x2bf   :  { %v2615_v12 = vcombine.high %v2613_v34, %v2613_v34  ;;  %v2674_v21 = vadd.f32 %v2614_v50, %v2252_v16  ;;  %v2675_v25 = vadd.f32 %v2613_v34, %v2251_v30  ;;  %v2616_v23 = vcombine.high %v2521_v10, %v2521_v10 }
 0x2c0   :  { %v2623_v55 = vrot.slane %v2521_v10, %v5688_v45  ;;  %v4328_v38 = vpop.f32.mrf.mxu1  ;;  %v5521_v24 = vadd.f32 %v3168_v37, %v2672_v36  ;;  %v5524_v35 = vadd.f32 %v5393_v43, %v2673_v44  ;;  %v2270_v30 = vcombine.high %v2268_v57, %v2268_v57 }
 0x2c1   :  { %v2676_v6 = vadd.f32 %v2615_v12, %v2253_v18  ;;  %v2630_v48 = vrot.slane %v2616_v23, %v5688_v45  ;;  %v5530_v60 = vadd.f32 %v3184_v22, %v2674_v21  ;;  %v5533_v28 = vadd.f32 %v5405_v19, %v2675_v25 }
 0x2c2   :  { %v2631_v26 = vcombine.high %v2623_v55, %v2623_v55  ;;  %v2677_v4 = vadd.f32 %v2623_v55, %v2261_v2  ;;  %v3458_v37 = vpop.f32.mrf.mxu1  ;;  %v3201_v59 = vcombine.high %v5429_v63, %v5429_v63  ;;  %v3202_v61 = vcombine.high %v3200_v0, %v3200_v0 }
 0x2c3   :  { %v2632_v20 = vcombine.high %v2630_v48, %v2630_v48  ;;  %v2679_v62 = vadd.f32 %v2630_v48, %v2268_v57  ;;  %v3487_v11 = vcombine.high %v3458_v37, %v3458_v37  ;;  %v3494_v16 = vrot.slane %v3458_v37, %v5688_v45 }
 0x2c4   :  { %v2678_v8 = vadd.f32 %v2631_v26, %v2269_v13  ;;  %v4351_v43 = vpop.f32.mrf.mxu1  ;;  %v5541_v22 = vadd.f32 %v3185_v42, %v2676_v6  ;;  %v5544_v46 = vadd.f32 %v5429_v63, %v2677_v4 }
 0x2c5   :  { %v2680_v27 = vadd.f32 %v2632_v20, %v2270_v30  ;;  %v3501_v17 = vrot.slane %v3487_v11, %v5688_v45  ;;  %v3502_v5 = vcombine.high %v3494_v16, %v3494_v16  ;;  %v3613_v54 = vadd.f32 %v3494_v16, %v5442_v41 }
 0x2c6   :  { %v3461_v18 = vpop.f32.mrf.mxu1  ;;  %v5548_v51 = vadd.f32 %v3201_v59, %v2678_v8  ;;  %v5550_v33 = vadd.f32 %v3200_v0, %v2679_v62 }
 0x2c7   :  { %v3503_v36 = vcombine.high %v3501_v17, %v3501_v17  ;;  %v3614_v19 = vadd.f32 %v3502_v5, %v5445_v52  ;;  %v3615_v42 = vadd.f32 %v3501_v17, %v5448_v9  ;;  %v3504_v34 = vcombine.high %v3461_v18, %v3461_v18 }
 0x2c8   :  { %v3511_v63 = vrot.slane %v3461_v18, %v5688_v45  ;;  %v4352_v50 = vpop.f32.mrf.mxu1  ;;  %v5555_v44 = vadd.f32 %v3202_v61, %v2680_v27  ;;  %v3658_v41 = vadd.f32 %v5350_v15, %v3613_v54 }
 0x2c9   :  { %v3616_v2 = vadd.f32 %v3503_v36, %v5455_v47  ;;  %v3659_v57 = vadd.f32 %v5387_v29, %v3614_v19  ;;  %v3660_v10 = vadd.f32 %v5373_v14, %v3615_v42  ;;  %v3518_v12 = vrot.slane %v3504_v34, %v5688_v45 }
 0x2ca   :  { %v3519_v21 = vcombine.high %v3511_v63, %v3511_v63  ;;  %v3617_v52 = vadd.f32 %v3511_v63, %v5458_v7  ;;  %v3466_v9 = vpop.f32.mrf.mxu1 }
 0x2cb   :  { %v3706_v25 = vcombine.low %v3658_v41, %v3659_v57  ;;  %v3661_v23 = vadd.f32 %v5350_v15, %v3616_v2  ;;  %v3521_v0 = vcombine.high %v3466_v9, %v3466_v9  ;;  %v3520_v55 = vcombine.high %v3518_v12, %v3518_v12 }
 0x2cc   :  { %v3618_v47 = vadd.f32 %v3519_v21, %v5467_v3  ;;  %v3619_v38 = vadd.f32 %v3518_v12, %v5470_v49  ;;  %v3662_v6 = vadd.f32 %v5387_v29, %v3617_v52  ;;  %v4355_v48 = vpop.f32.mrf.mxu1  ;;  %v3720_v30 = vrot.slane %v3660_v10, %v5688_v45 }
 0x2cd   :  { %v3713_v13 = vrot.slane %v3706_v25, %v5688_v45  ;;  %v3528_v7 = vrot.slane %v3466_v9, %v5688_v45  ;;  %v3535_v26 = vrot.slane %v3521_v0, %v5688_v45  ;;  %v3620_v4 = vadd.f32 %v3520_v55, %v5477_v40 }
 0x2ce   :  { %v3663_v37 = vadd.f32 %v5373_v14, %v3618_v47  ;;  %v3664_v20 = vadd.f32 %v5350_v15, %v3619_v38  ;;  %v3722_v3 = vcombine.low %v3661_v23, %v3662_v6  ;;  %v3469_v62 = vpop.f32.mrf.mxu1 }
 0x2cf   :  { %v3721_v49 = vcombine.low %v3713_v13, %v3720_v30  ;;  %v3536_v11 = vcombine.high %v3528_v7, %v3528_v7  ;;  %v3537_v16 = vcombine.high %v3535_v26, %v3535_v26  ;;  %v3621_v59 = vadd.f32 %v3528_v7, %v5480_v39 }
 0x2d0   :  { %v3665_v8 = vadd.f32 %v5387_v29, %v3620_v4  ;;  %v3729_v43 = vrot.slane %v3722_v3, %v5688_v45  ;;  %v3736_v27 = vrot.slane %v3663_v37, %v5688_v45  ;;  %v3623_v17 = vadd.f32 %v3535_v26, %v5489_v56  ;;  %v4356_v40 = vpop.f32.mrf.mxu1 }
 0x2d1   :  { %v3843_v5 = vsel %vm3842_vm0, %v3721_v49, -inf  ;;  %v3622_v54 = vadd.f32 %v3536_v11, %v5486_v31  ;;  %v3624_v61 = vadd.f32 %v3537_v16, %v5497_v32  ;;  %v3666_v18 = vadd.f32 %v5373_v14, %v3621_v59 }
 0x2d2   :  { %v3844_v36 = vrot.slane %v3843_v5, 4  ;;  %v3737_v19 = vcombine.low %v3729_v43, %v3736_v27  ;;  %v3738_v39 = vcombine.low %v3664_v20, %v3665_v8  ;;  %v3668_v42 = vadd.f32 %v5387_v29, %v3623_v17  ;;  %v3474_v34 = vpop.f32.mrf.mxu1 }
 0x2d3   :  { %v3667_v63 = vadd.f32 %v5350_v15, %v3622_v54  ;;  %v3669_v50 = vadd.f32 %v5373_v14, %v3624_v61  ;;  %v3752_v56 = vrot.slane %v3666_v18, %v5688_v45  ;;  %v3538_v2 = vcombine.high %v3469_v62, %v3469_v62 }
 0x2d4   :  { %v3845_v41 = vmax.f32 %v3843_v5, %v3844_v36  ;;  %v3850_v31 = vsel %vm3842_vm0, %v3737_v19, -inf  ;;  %v3745_v32 = vrot.slane %v3738_v39, %v5688_v45  ;;  %v3545_v57 = vrot.slane %v3469_v62, %v5688_v45  ;;  %v4359_v10 = vpop.f32.mrf.mxu1 }
 0x2d5   :  { %v3851_v12 = vrot.slane %v3850_v31, 4  ;;  %v3754_v21 = vcombine.low %v3667_v63, %v3668_v42  ;;  %v3768_v52 = vrot.slane %v3669_v50, %v5688_v45  ;;  %v3552_v9 = vrot.slane %v3538_v2, %v5688_v45 }
 0x2d6   :  { %v3846_v25 = vrot.slane %v3845_v41, 2  ;;  %v3753_v23 = vcombine.low %v3745_v32, %v3752_v56  ;;  %v3553_v0 = vcombine.high %v3545_v57, %v3545_v57  ;;  %v3625_v55 = vadd.f32 %v3545_v57, %v5500_v1  ;;  %v5593_v47 = vpop.f32.mrf.mxu1 }
 0x2d7   :  { %v3852_v38 = vmax.f32 %v3850_v31, %v3851_v12  ;;  %v3761_v6 = vrot.slane %v3754_v21, %v5688_v45  ;;  %v3554_v48 = vcombine.high %v3552_v9, %v3552_v9  ;;  %v3627_v13 = vadd.f32 %v3552_v9, %v5511_v53 }
 0x2d8   :  { %v3847_v30 = vmax.f32 %v3845_v41, %v3846_v25  ;;  %v3857_v7 = vsel %vm3842_vm0, %v3753_v23, -inf  ;;  %v3626_v26 = vadd.f32 %v3553_v0, %v5508_v58  ;;  %v3670_v4 = vadd.f32 %v5350_v15, %v3625_v55  ;;  %v4360_v37 = vpop.f32.mrf.mxu1 }
 0x2d9   :  { %v3853_v20 = vrot.slane %v3852_v38, 2  ;;  %v3769_v3 = vcombine.low %v3761_v6, %v3768_v52  ;;  %v3858_v62 = vrot.slane %v3857_v7, 4  ;;  %v3628_v1 = vadd.f32 %v3554_v48, %v5521_v24 }
 0x2da   :  { %v3848_v49 = vrot.slane %v3847_v30, 1  ;;  %v3671_v11 = vadd.f32 %v5387_v29, %v3626_v26  ;;  %v3672_v16 = vadd.f32 %v5373_v14, %v3627_v13  ;;  %v3555_v59 = vcombine.high %v3474_v34, %v3474_v34 }
 0x2db   :  { %v3854_v53 = vmax.f32 %v3852_v38, %v3853_v20  ;;  %v3859_v8 = vmax.f32 %v3857_v7, %v3858_v62  ;;  %v3864_v43 = vsel %vm3842_vm0, %v3769_v3, -inf  ;;  %v3562_v58 = vrot.slane %v3474_v34, %v5688_v45 }
 0x2dc   :  { %v3849_v27 = vmax.f32 %v3847_v30, %v3848_v49  ;;  %v3865_v17 = vrot.slane %v3864_v43, 4  ;;  %v3770_v40 = vcombine.low %v3670_v4, %v3671_v11  ;;  %v3784_v5 = vrot.slane %v3672_v16, %v5688_v45 }
 0x2dd   :  { %v3855_v54 = vrot.slane %v3854_v53, 1  ;;  %v3860_v24 = vrot.slane %v3859_v8, 2  ;;  %v3569_v61 = vrot.slane %v3555_v59, %v5688_v45  ;;  %v3570_v18 = vcombine.high %v3562_v58, %v3562_v58 }
 0x2de   :  { %v3899_v36 = vmax.f32 %v3849_v27, 0.0  ;;  %v3866_v19 = vmax.f32 %v3864_v43, %v3865_v17  ;;  %v3777_v39 = vrot.slane %v3770_v40, %v5688_v45  ;;  %v3629_v42 = vadd.f32 %v3562_v58, %v5524_v35 }
 0x2df   :  { %v3856_v63 = vmax.f32 %v3854_v53, %v3855_v54  ;;  %v3861_v50 = vmax.f32 %v3859_v8, %v3860_v24  ;;  %v3571_v34 = vcombine.high %v3569_v61, %v3569_v61  ;;  %v3630_v56 = vadd.f32 %v3570_v18, %v5530_v60 }
 0x2e0   :  { %v3907_v2 = vpack.c.bf16 %v3899_v36, %v3899_v36  ;;  %v3867_v41 = vrot.slane %v3866_v19, 2  ;;  %v3785_v31 = vcombine.low %v3777_v39, %v3784_v5  ;;  %v3631_v32 = vadd.f32 %v3569_v61, %v5533_v28 }
 0x2e1   :  { %v3900_v57 = vmax.f32 %v3856_v63, 0.0  ;;  %v3862_v10 = vrot.slane %v3861_v50, 1  ;;  %v3632_v12 = vadd.f32 %v3571_v34, %v5541_v22  ;;  %v3673_v21 = vadd.f32 %v5350_v15, %v3628_v1 }
 0x2e2   :  { %v3946_v52 = vunpack.c.l.b16 %v3907_v2  ;;  %v3868_v9 = vmax.f32 %v3866_v19, %v3867_v41  ;;  %v3871_v35 = vsel %vm3842_vm0, %v3785_v31, -inf  ;;  %v3674_v25 = vadd.f32 %v5387_v29, %v3629_v42 }
 0x2e3   :  { %v3908_v23 = vpack.c.bf16 %v3900_v57, %v3900_v57  ;;  %v3863_v60 = vmax.f32 %v3861_v50, %v3862_v10  ;;  %v3872_v0 = vrot.slane %v3871_v35, 4  ;;  %v3675_v55 = vadd.f32 %v5373_v14, %v3630_v56 }
 0x2e4   :  { %v3869_v38 = vrot.slane %v3868_v9, 1  ;;  %v3676_v28 = vadd.f32 %v5350_v15, %v3631_v32  ;;  %v3677_v6 = vadd.f32 %v5387_v29, %v3632_v12  ;;  %v3786_v22 = vcombine.low %v3673_v21, %v3674_v25 }
 0x2e5   :  { %v3947_v48 = vunpack.c.l.b16 %v3908_v23  ;;  %v3901_v13 = vmax.f32 %v3863_v60, 0.0  ;;  %v3873_v30 = vmax.f32 %v3871_v35, %v3872_v0  ;;  %v3800_v7 = vrot.slane %v3675_v55, %v5688_v45 }
 0x2e6   :  { %v3870_v26 = vmax.f32 %v3868_v9, %v3869_v38  ;;  %v3793_v4 = vrot.slane %v3786_v22, %v5688_v45  ;;  %v3802_v37 = vcombine.low %v3676_v28, %v3677_v6  ;;  %v3572_v20 = vcombine.high %v5593_v47, %v5593_v47 }
 0x2e7   :  { %v3955_v3 = vsel %vm3954_vm3, %v3947_v48, %v3946_v52  ;;  %v3909_v62 = vpack.c.bf16 %v3901_v13, %v3901_v13  ;;  %v3874_v1 = vrot.slane %v3873_v30, 2  ;;  %v3579_v49 = vrot.slane %v5593_v47, %v5688_v45 }
 0x2e8   :  { %v3902_v11 = vmax.f32 %v3870_v26, 0.0  ;;  %v3801_v16 = vcombine.low %v3793_v4, %v3800_v7  ;;  %v3586_v59 = vrot.slane %v3572_v20, %v5688_v45  ;;  %v3809_v53 = vrot.slane %v3802_v37, %v5688_v45 }
 0x2e9   :  { %v3948_v8 = vunpack.c.l.b16 %v3909_v62  ;;  %v3875_v43 = vmax.f32 %v3873_v30, %v3874_v1  ;;  %v3587_v58 = vcombine.high %v3579_v49, %v3579_v49  ;;  %v3633_v27 = vadd.f32 %v3579_v49, %v5544_v46 }
 0x2ea   :  { %v3910_v17 = vpack.c.bf16 %v3902_v11, %v3902_v11  ;;  %v3878_v40 = vsel %vm3842_vm0, %v3801_v16, -inf  ;;  %v3588_v5 = vcombine.high %v3586_v59, %v3586_v59  ;;  %v3635_v54 = vadd.f32 %v3586_v59, %v5550_v33  ;;  %v4189_v59 = vld [vmem:[%s5654_s5] ss:$0 sm:$0xff] }
 0x2eb   :  { %v3957_v24 = vsel %vm3956_vm4, %v3948_v8, %v3955_v3  ;;  %v3876_v47 = vrot.slane %v3875_v43, 1  ;;  %v3879_v61 = vrot.slane %v3878_v40, 4  ;;  %v3634_v18 = vadd.f32 %v3587_v58, %v5548_v51 }
 0x2ec   :  { %v3949_v36 = vunpack.c.l.b16 %v3910_v17  ;;  %v3636_v19 = vadd.f32 %v3588_v5, %v5555_v44  ;;  %v3678_v39 = vadd.f32 %v5373_v14, %v3633_v27  ;;  %v3680_v42 = vadd.f32 %v5387_v29, %v3635_v54 }
 0x2ed   :  { %v3877_v46 = vmax.f32 %v3875_v43, %v3876_v47  ;;  %v3880_v63 = vmax.f32 %v3878_v40, %v3879_v61  ;;  %v3679_v50 = vadd.f32 %v5350_v15, %v3634_v18 }
 0x2ee   :  { %v3681_v34 = vadd.f32 %v5373_v14, %v3636_v19  ;;  %v3816_v33 = vrot.slane %v3678_v39, %v5688_v45  ;;  %v3959_v56 = vsel %vm3958_vm5, %v3949_v36, %v3957_v24 }
 0x2ef   :  { %v3903_v2 = vmax.f32 %v3877_v46, 0.0  ;;  %v3881_v41 = vrot.slane %v3880_v63, 2  ;;  %v3818_v51 = vcombine.low %v3679_v50, %v3680_v42 }
 0x2f0   :  { %v3817_v31 = vcombine.low %v3809_v53, %v3816_v33  ;;  %v3832_v44 = vrot.slane %v3681_v34, %v5688_v45 }
 0x2f1   :  { %v3911_v32 = vpack.c.bf16 %v3903_v2, %v3903_v2  ;;  %v3882_v57 = vmax.f32 %v3880_v63, %v3881_v41  ;;  %v3825_v29 = vrot.slane %v3818_v51, %v5688_v45 }
 0x2f2   :  { %v3885_v10 = vsel %vm3842_vm0, %v3817_v31, -inf }
 0x2f3   :  { %v3950_v15 = vunpack.c.l.b16 %v3911_v32  ;;  %v3883_v12 = vrot.slane %v3882_v57, 1  ;;  %v3833_v14 = vcombine.low %v3825_v29, %v3832_v44  ;;  %v3886_v21 = vrot.slane %v3885_v10, 4 }
 0x2f5   :  { %v3884_v52 = vmax.f32 %v3882_v57, %v3883_v12  ;;  %v3887_v9 = vmax.f32 %v3885_v10, %v3886_v21  ;;  %v3892_v35 = vsel %vm3842_vm0, %v3833_v14, -inf  ;;  %v3961_v25 = vsel %vm3960_vm6, %v3950_v15, %v3959_v56 }
 0x2f6   :  { %v3893_v23 = vrot.slane %v3892_v35, 4 }
 0x2f7   :  { %v3904_v60 = vmax.f32 %v3884_v52, 0.0  ;;  %v3888_v0 = vrot.slane %v3887_v9, 2 }
 0x2f8   :  { %v3894_v55 = vmax.f32 %v3892_v35, %v3893_v23 }
 0x2f9   :  { %v3912_v38 = vpack.c.bf16 %v3904_v60, %v3904_v60  ;;  %v3889_v28 = vmax.f32 %v3887_v9, %v3888_v0 }
 0x2fa   :  { %v3895_v6 = vrot.slane %v3894_v55, 2 }
 0x2fb   :  { %v3951_v45 = vunpack.c.l.b16 %v3912_v38  ;;  %v3890_v22 = vrot.slane %v3889_v28, 1 }
 0x2fc   :  { %v3896_v48 = vmax.f32 %v3894_v55, %v3895_v6 }
 0x2fd   :  { %v3891_v13 = vmax.f32 %v3889_v28, %v3890_v22  ;;  %v3963_v30 = vsel %vm3962_vm7, %v3951_v45, %v3961_v25 }
 0x2fe   :  { %v3897_v7 = vrot.slane %v3896_v48, 1 }
 0x2ff   :  { %v3905_v26 = vmax.f32 %v3891_v13, 0.0 }
 0x300   :  { %v3898_v4 = vmax.f32 %v3896_v48, %v3897_v7 }
 0x301   :  { %v3913_v37 = vpack.c.bf16 %v3905_v26, %v3905_v26 }
 0x302   :  { %v3906_v20 = vmax.f32 %v3898_v4, 0.0 }
 0x303   :  { %v3952_v3 = vunpack.c.l.b16 %v3913_v37 }
 0x304   :  { %v3914_v62 = vpack.c.bf16 %v3906_v20, %v3906_v20 }
 0x305   :  { %v3965_v1 = vsel %vm3964_vm8, %v3952_v3, %v3963_v30 }
 0x306   :  { %v3953_v49 = vunpack.c.l.b16 %v3914_v62 }
 0x308   :  { %v3967_v11 = vsel %vm3966_vm9, %v3953_v49, %v3965_v1 }
 0x309   :  { %v3968_v16 = vpack.c.b16 %v3967_v11, %v3967_v11 }
 0x30b   :  { %4378 = vmatmul.mubr.bf16.vlgmr.msra.gmra.mxu0 %v3968_v16 }
 0x3cb   :  { %v4052_v53 = vpop.f32.mrf.mxu0 }
 0x3cc   :  { %v4053_v8 = vadd.f32 %v4189_v59, %v4052_v53 }
 0x3cd   :  { %v4379_v43 = vpop.f32.mrf.mxu0 }
 0x3ce   :  { %4058 = vst [vmem:[%s5655_s6] sm:$0xff] %v4053_v8 }
 0x3cf   :  { %v4055_v58 = vpop.f32.mrf.mxu0 }
 0x3d1   :  { %v4380_v27 = vpop.f32.mrf.mxu0 }
 0x3d2   :  { %4063 = vsyncpa [#allocation3], 1 }

</bundles_post_ra>
